<compile_context>
chip_gen: v5e
topology: v5e:2x2
jax: 0.10.0
libtpu: 0.0.40
codegen_flags: <defaults>
</compile_context>

<pallas_src>
import functools

import jax
import jax.numpy as jnp
from jax import lax
from jax.experimental import pallas as pl
from jax.experimental.pallas import tpu as pltpu

TEMPERATURE = 0.07
LOSS_WEIGHTS = {"infonce": 0.4, "nt_xent": 0.3, "supervised": 0.3}
INPUT_DIM = 32        # input_dim for the projection heads (module shapes)
PROJECTION_DIM = 32   # projection_dim (kept small for the demo)

_LANE = 128
_RECALL_KS = (1, 5, 10)
_OUT_SLOTS = 16       # 7 scalar losses/metrics + 3 recalls x 3 values


# ---------------------------------------------------------------------------
# Single fused kernel: projection heads + normalize + all losses + metrics
# ---------------------------------------------------------------------------
def _fused_kernel(xv_ref, xt_ref,
                  vw1_ref, vb1_ref, vw2_ref, vb2_ref,
                  tw1_ref, tb1_ref, tw2_ref, tb2_ref,
                  lblc_ref, lblr_ref,
                  out_ref, *,
                  inv_temp, w_infonce, w_ntxent, w_sup,
                  compute_supervised, recall_ks):
    f32 = jnp.float32
    dn = (((1,), (1,)), ((), ()))        # contract last dims: A @ B.T

    def project(x_ref, w1_ref, b1_ref, w2_ref, b2_ref):
        # Linear -> ReLU -> Linear -> L2 normalize (F.normalize p=2, eps=1e-12)
        x = x_ref[...].astype(f32)
        h = jnp.dot(x, w1_ref[...], preferred_element_type=f32) + b1_ref[...]
        h = jnp.maximum(h, 0.0)
        y = jnp.dot(h, w2_ref[...], preferred_element_type=f32) + b2_ref[...]
        sumsq = jnp.sum(y * y, axis=1, keepdims=True)
        inv = lax.rsqrt(jnp.maximum(sumsq, 1e-24))   # == 1/max(||y||, 1e-12)
        return y * inv

    vn = project(xv_ref, vw1_ref, vb1_ref, vw2_ref, vb2_ref)    # [B, P] f32
    tn = project(xt_ref, tw1_ref, tb1_ref, tw2_ref, tb2_ref)    # [B, P] f32
    B = vn.shape[0]

    # bf16 MXU operands (f32 accumulation) for the three gram matmuls.
    vb = vn.astype(jnp.bfloat16)
    tb = tn.astype(jnp.bfloat16)
    sim = lax.dot_general(vb, tb, dn, preferred_element_type=f32) * inv_temp
    svv = lax.dot_general(vb, vb, dn, preferred_element_type=f32) * inv_temp
    stt = lax.dot_general(tb, tb, dn, preferred_element_type=f32) * inv_temp

    row = lax.broadcasted_iota(jnp.int32, (B, B), 0)
    col = lax.broadcasted_iota(jnp.int32, (B, B), 1)
    is_diag = row == col
    neg_big = jnp.float32(-1.0e9)
    svv_m = jnp.where(is_diag, neg_big, svv)     # self-similarity masked (NT-Xent)
    stt_m = jnp.where(is_diag, neg_big, stt)

    # Masked diagonal computed once; column view derived from the row view.
    sim_diag = jnp.where(is_diag, sim, 0.0)
    diag_r = jnp.sum(sim_diag, axis=1, keepdims=True)            # [B, 1] = sim[i,i]
    trace_sim = jnp.sum(diag_r)
    diag_c = jnp.reshape(diag_r, (1, B))                         # small transpose

    # ---- InfoNCE: CE(sim, arange) and CE(sim.T, arange); targets = diagonal.
    m_r = jnp.max(sim, axis=1, keepdims=True)                    # [B, 1]
    e_r = jnp.exp(sim - m_r)                                     # [B, B]
    s_r = jnp.sum(e_r, axis=1, keepdims=True)
    lse_r = jnp.log(s_r) + m_r
    m_c = jnp.max(sim, axis=0, keepdims=True)                    # [1, B]
    e_c = jnp.exp(sim - m_c)
    s_c = jnp.sum(e_c, axis=0, keepdims=True)
    lse_c = jnp.log(s_c) + m_c
    loss_v2t = (jnp.sum(lse_r) - trace_sim) / B
    loss_t2v = (jnp.sum(lse_c) - trace_sim) / B
    infonce = 0.5 * (loss_v2t + loss_t2v)

    # ---- NT-Xent over implicit [2B, 2B]; target logit of every row = sim[i,i].
    # Row / col softmax statistics of `sim` are reused (no extra exp over sim).
    m_v = jnp.maximum(m_r, jnp.max(svv_m, axis=1, keepdims=True))
    se_v = (jnp.exp(m_r - m_v) * s_r
            + jnp.sum(jnp.exp(svv_m - m_v), axis=1, keepdims=True))
    lse_v = jnp.log(se_v) + m_v                                   # [B, 1]
    m_t = jnp.maximum(m_c, jnp.max(stt_m, axis=0, keepdims=True))
    se_t = (jnp.exp(m_c - m_t) * s_c
            + jnp.sum(jnp.exp(stt_m - m_t), axis=0, keepdims=True))
    lse_t = jnp.log(se_t) + m_t                                   # [1, B]
    nt_xent = (jnp.sum(lse_v) + jnp.sum(lse_t) - 2.0 * trace_sim) / (2 * B)

    # ---- Supervised contrastive (class labels).  Denominator == non-self LSE
    #      == lse_v / lse_t (shared with NT-Xent).
    if compute_supervised:
        eq = lblc_ref[...] == lblr_ref[...]                       # bool [B, B]
        pos = jnp.logical_and(eq, jnp.logical_not(is_diag))       # positives, no self
        eq_f = eq.astype(f32)
        cnt_r = jnp.sum(eq_f, axis=1, keepdims=True)              # [B, 1]
        cnt_c = jnp.reshape(cnt_r, (1, B))                        # eq symmetric
        pc_r = jnp.maximum(2.0 * cnt_r - 1.0, 1.0)
        pc_c = jnp.maximum(2.0 * cnt_c - 1.0, 1.0)
        sim_eq = jnp.where(eq, sim, 0.0)                          # one operand, 2 reduces
        pos_v = (jnp.sum(jnp.where(pos, svv, 0.0), axis=1, keepdims=True)
                 + jnp.sum(sim_eq, axis=1, keepdims=True)) / pc_r
        pos_t = (jnp.sum(sim_eq, axis=0, keepdims=True)
                 + jnp.sum(jnp.where(pos, stt, 0.0), axis=0, keepdims=True)) / pc_c
        sup = (jnp.sum(lse_v - pos_v) + jnp.sum(lse_t - pos_t)) / (2 * B)
    else:
        sup = jnp.float32(0.0)

    total = w_infonce * infonce + w_ntxent * nt_xent + w_sup * sup

    # ---- Metrics via diagonal ranks (targets are arange):
    #      rank_i = #{j : sim[i,j] > sim[i,i]};  acc = rank==0;  recall@k = rank<k.
    rank_r = jnp.sum((sim > diag_r).astype(f32), axis=1, keepdims=True)
    rank_c = jnp.sum((sim > diag_c).astype(f32), axis=0, keepdims=True)
    v2t_acc = jnp.sum((rank_r < 0.5).astype(f32)) / B
    t2v_acc = jnp.sum((rank_c < 0.5).astype(f32)) / B

    out_ref[0] = total
    out_ref[1] = infonce
    out_ref[2] = nt_xent
    out_ref[3] = sup
    out_ref[4] = v2t_acc
    out_ref[5] = t2v_acc
    out_ref[6] = 0.5 * (v2t_acc + t2v_acc)

    slot = 7
    for k in recall_ks:
        ka = min(k, B)
        thr = float(ka) - 0.5
        r_v2t = jnp.sum((rank_r < thr).astype(f32)) / B
        r_t2i = jnp.sum((rank_c < thr).astype(f32)) / B
        out_ref[slot] = r_v2t
        out_ref[slot + 1] = r_t2i
        out_ref[slot + 2] = 0.5 * (r_v2t + r_t2i)
        slot += 3


# ---------------------------------------------------------------------------
# Padding helpers (lane-dense feature / projection dims, mathematically exact)
# ---------------------------------------------------------------------------
def _round_up(n, m):
    return ((n + m - 1) // m) * m


def _pad2d(a, rows_to, cols_to):
    pr = rows_to - a.shape[0]
    pc = cols_to - a.shape[1]
    if pr == 0 and pc == 0:
        return a
    return jnp.pad(a, ((0, pr), (0, pc)))


# ---------------------------------------------------------------------------
# Module forward (thin glue around the single fused pallas_call)
# ---------------------------------------------------------------------------
def multimodal_mixed_contrastive_loss(vision_features, text_features, params,
                                      labels=None, temperature=TEMPERATURE,
                                      loss_weights=None):
    """Mirrors MultiModalMixedContrastiveLoss.forward with add_projection=True,
    match_ids=None (position-based targets), reduction='mean', eval() mode."""
    if loss_weights is None:
        loss_weights = LOSS_WEIGHTS
    B = vision_features.shape[0]
    if B != text_features.shape[0]:
        raise ValueError("Batch size mismatch between vision and text features")

    vw1, vb1, vw2, vb2, tw1, tb1, tw2, tb2 = params
    D = vw1.shape[0]
    P = vw2.shape[1]
    dpad = _round_up(max(D, 1), _LANE)
    ppad = _round_up(max(P, 1), _LANE)

    # Zero-pad feature / hidden / projection dims to 128 lanes. Exact: padded
    # input cols hit zero weight rows, padded hidden/output cols stay zero and
    # contribute nothing to ReLU, L2 norm, or the gram matmuls.
    xv = _pad2d(vision_features.astype(jnp.float32), B, dpad)
    xt = _pad2d(text_features.astype(jnp.float32), B, dpad)
    vw1p, vb1p = _pad2d(vw1, dpad, dpad), _pad2d(vb1, 1, dpad)
    vw2p, vb2p = _pad2d(vw2, dpad, ppad), _pad2d(vb2, 1, ppad)
    tw1p, tb1p = _pad2d(tw1, dpad, dpad), _pad2d(tb1, 1, dpad)
    tw2p, tb2p = _pad2d(tw2, dpad, ppad), _pad2d(tb2, 1, ppad)

    # match_ids=None -> position-based targets (arange) => target logit = diag.
    # TODO(synk): training-mode small-batch similarity noise (torch.randn_like)
    # and match_ids random positive sampling (host-side string compare + randint)
    # are stochastic / host-side; this implements the deterministic eval()
    # path with match_ids=None, matching the PyTorch module in that mode.
    has_labels = labels is not None
    lbl = labels.astype(jnp.int32) if has_labels else jnp.zeros((B,), jnp.int32)
    lbl_col = lbl.reshape(B, 1)
    lbl_row = lbl.reshape(1, B)

    kernel = functools.partial(
        _fused_kernel,
        inv_temp=float(1.0 / temperature),
        w_infonce=float(loss_weights["infonce"]),
        w_ntxent=float(loss_weights["nt_xent"]),
        w_sup=float(loss_weights["supervised"]),
        compute_supervised=has_labels,
        recall_ks=_RECALL_KS,
    )

    # Scoped VMEM sized to the live working set (~12-16 live [B,B] f32 blocks
    # plus the lane-padded feature/weight tiles); defaults are only 16/32 MiB.
    bb = 4 * B * B
    est = 16 * bb + 12 * 4 * B * max(dpad, ppad) + 4 * dpad * max(dpad, ppad) + (2 << 20)
    vmem_limit = int(min(max(est, 16 << 20), 64 << 20))

    vmem = pl.BlockSpec(memory_space=pltpu.MemorySpace.VMEM)
    smem = pl.BlockSpec(memory_space=pltpu.MemorySpace.SMEM)
    vals = pl.pallas_call(
        kernel,
        out_shape=jax.ShapeDtypeStruct((_OUT_SLOTS,), jnp.float32),
        in_specs=[vmem] * 12,
        out_specs=smem,
        compiler_params=pltpu.CompilerParams(vmem_limit_bytes=vmem_limit),
    )(xv, xt,
      vw1p, vb1p, vw2p, vb2p, tw1p, tb1p, tw2p, tb2p,
      lbl_col, lbl_row)

    recalls = {}
    slot = 7
    for k in _RECALL_KS:
        recalls[f"v2t_recall@{k}"] = vals[slot]
        recalls[f"t2i_recall@{k}"] = vals[slot + 1]
        recalls[f"avg_recall@{k}"] = vals[slot + 2]
        slot += 3

    return {
        "loss": vals[0],
        "loss_infonce": vals[1],
        "loss_nt_xent": vals[2],
        "loss_supervised": vals[3],
        "v2t_accuracy": vals[4],
        "t2v_accuracy": vals[5],
        "accuracy": vals[6],
        "recalls": recalls,
    }


# ---------------------------------------------------------------------------
# Deterministic parameter init (shapes from __init__ with add_projection=True)
# ---------------------------------------------------------------------------
def init_params(key, input_dim=INPUT_DIM, projection_dim=PROJECTION_DIM):
    def linear(k, fan_in, fan_out):
        kw, kb = jax.random.split(k)
        w = jax.random.normal(kw, (fan_in, fan_out), jnp.float32) / jnp.sqrt(fan_in)
        b = 0.01 * jax.random.normal(kb, (1, fan_out), jnp.float32)
        return w, b

    k = jax.random.split(key, 4)
    vw1, vb1 = linear(k[0], input_dim, input_dim)        # vision Linear(D, D)
    vw2, vb2 = linear(k[1], input_dim, projection_dim)   # vision Linear(D, P)
    tw1, tb1 = linear(k[2], input_dim, input_dim)        # text   Linear(D, D)
    tw2, tb2 = linear(k[3], input_dim, projection_dim)   # text   Linear(D, P)
    return (vw1, vb1, vw2, vb2, tw1, tb1, tw2, tb2)


if __name__ == "__main__":
    key = jax.random.PRNGKey(0)
    k_v, k_t, k_p = jax.random.split(key, 3)
    B = 8
    vision = jax.random.normal(k_v, (B, INPUT_DIM), jnp.float32)
    text = jax.random.normal(k_t, (B, INPUT_DIM), jnp.float32)
    labels = jnp.array([0, 1, 0, 1, 2, 2, 3, 3], jnp.int32)
    params = init_params(k_p)

    out = multimodal_mixed_contrastive_loss(vision, text, params, labels=labels)
    jax.block_until_ready(out)
    print("KERNEL_OK")
</pallas_src>

<mosaic_0001>
module attributes {stable_mosaic.version = 11 : i64} {
  func.func @_fused_kernel(%arg0: memref<8x128xf32, #tpu.memory_space<vmem>>, %arg1: memref<8x128xf32, #tpu.memory_space<vmem>>, %arg2: memref<128x128xf32, #tpu.memory_space<vmem>>, %arg3: memref<1x128xf32, #tpu.memory_space<vmem>>, %arg4: memref<128x128xf32, #tpu.memory_space<vmem>>, %arg5: memref<1x128xf32, #tpu.memory_space<vmem>>, %arg6: memref<128x128xf32, #tpu.memory_space<vmem>>, %arg7: memref<1x128xf32, #tpu.memory_space<vmem>>, %arg8: memref<128x128xf32, #tpu.memory_space<vmem>>, %arg9: memref<1x128xf32, #tpu.memory_space<vmem>>, %arg10: memref<8x1xi32, #tpu.memory_space<vmem>>, %arg11: memref<1x8xi32, #tpu.memory_space<vmem>>, %arg12: memref<16xf32, #tpu.memory_space<smem>>) attributes {dimension_semantics = [], scalar_prefetch = 0 : i64, scratch_operands = 0 : i64, tpu.core_type = #tpu.core_type<tc>} {
    %c0 = arith.constant 0 : index
    %c0_0 = arith.constant 0 : index
    %0 = vector.load %arg0[%c0, %c0_0] : memref<8x128xf32, #tpu.memory_space<vmem>>, vector<8x128xf32>
    %c0_1 = arith.constant 0 : index
    %c0_2 = arith.constant 0 : index
    %1 = vector.load %arg2[%c0_1, %c0_2] : memref<128x128xf32, #tpu.memory_space<vmem>>, vector<128x128xf32>
    %cst = arith.constant dense<0.000000e+00> : vector<8x128xf32>
    %2 = tpu.matmul %0, %1, %cst {dimension_numbers = #tpu.dot_dimension_numbers<[1], [0], [0], [1], [0, 0, 1, 1], [], []>} : vector<8x128xf32>, vector<128x128xf32>, vector<8x128xf32> -> vector<8x128xf32>
    %c0_3 = arith.constant 0 : index
    %c0_4 = arith.constant 0 : index
    %3 = vector.load %arg3[%c0_3, %c0_4] : memref<1x128xf32, #tpu.memory_space<vmem>>, vector<1x128xf32>
    %4 = vector.broadcast %3 : vector<1x128xf32> to vector<8x128xf32>
    %5 = arith.addf %2, %4 : vector<8x128xf32>
    %cst_5 = arith.constant 0.000000e+00 : f32
    %6 = vector.broadcast %cst_5 : f32 to vector<8x128xf32>
    %7 = arith.maximumf %5, %6 : vector<8x128xf32>
    %c0_6 = arith.constant 0 : index
    %c0_7 = arith.constant 0 : index
    %8 = vector.load %arg4[%c0_6, %c0_7] : memref<128x128xf32, #tpu.memory_space<vmem>>, vector<128x128xf32>
    %cst_8 = arith.constant dense<0.000000e+00> : vector<8x128xf32>
    %9 = tpu.matmul %7, %8, %cst_8 {dimension_numbers = #tpu.dot_dimension_numbers<[1], [0], [0], [1], [0, 0, 1, 1], [], []>} : vector<8x128xf32>, vector<128x128xf32>, vector<8x128xf32> -> vector<8x128xf32>
    %c0_9 = arith.constant 0 : index
    %c0_10 = arith.constant 0 : index
    %10 = vector.load %arg5[%c0_9, %c0_10] : memref<1x128xf32, #tpu.memory_space<vmem>>, vector<1x128xf32>
    %11 = vector.broadcast %10 : vector<1x128xf32> to vector<8x128xf32>
    %12 = arith.addf %9, %11 : vector<8x128xf32>
    %13 = arith.mulf %12, %12 : vector<8x128xf32>
    %cst_11 = arith.constant dense<0.000000e+00> : vector<8xf32>
    %14 = vector.multi_reduction <add>, %13, %cst_11 [1] : vector<8x128xf32> to vector<8xf32>
    %15 = vector.shape_cast %14 : vector<8xf32> to vector<8x1xf32>
    %cst_12 = arith.constant 1.000000e-24 : f32
    %16 = vector.broadcast %cst_12 : f32 to vector<8x1xf32>
    %17 = arith.maximumf %15, %16 : vector<8x1xf32>
    %18 = math.rsqrt %17 : vector<8x1xf32>
    %19 = vector.broadcast %18 : vector<8x1xf32> to vector<8x128xf32>
    %20 = arith.mulf %12, %19 : vector<8x128xf32>
    %c0_13 = arith.constant 0 : index
    %c0_14 = arith.constant 0 : index
    %21 = vector.load %arg1[%c0_13, %c0_14] : memref<8x128xf32, #tpu.memory_space<vmem>>, vector<8x128xf32>
    %c0_15 = arith.constant 0 : index
    %c0_16 = arith.constant 0 : index
    %22 = vector.load %arg6[%c0_15, %c0_16] : memref<128x128xf32, #tpu.memory_space<vmem>>, vector<128x128xf32>
    %cst_17 = arith.constant dense<0.000000e+00> : vector<8x128xf32>
    %23 = tpu.matmul %21, %22, %cst_17 {dimension_numbers = #tpu.dot_dimension_numbers<[1], [0], [0], [1], [0, 0, 1, 1], [], []>} : vector<8x128xf32>, vector<128x128xf32>, vector<8x128xf32> -> vector<8x128xf32>
    %c0_18 = arith.constant 0 : index
    %c0_19 = arith.constant 0 : index
    %24 = vector.load %arg7[%c0_18, %c0_19] : memref<1x128xf32, #tpu.memory_space<vmem>>, vector<1x128xf32>
    %25 = vector.broadcast %24 : vector<1x128xf32> to vector<8x128xf32>
    %26 = arith.addf %23, %25 : vector<8x128xf32>
    %cst_20 = arith.constant 0.000000e+00 : f32
    %27 = vector.broadcast %cst_20 : f32 to vector<8x128xf32>
    %28 = arith.maximumf %26, %27 : vector<8x128xf32>
    %c0_21 = arith.constant 0 : index
    %c0_22 = arith.constant 0 : index
    %29 = vector.load %arg8[%c0_21, %c0_22] : memref<128x128xf32, #tpu.memory_space<vmem>>, vector<128x128xf32>
    %cst_23 = arith.constant dense<0.000000e+00> : vector<8x128xf32>
    %30 = tpu.matmul %28, %29, %cst_23 {dimension_numbers = #tpu.dot_dimension_numbers<[1], [0], [0], [1], [0, 0, 1, 1], [], []>} : vector<8x128xf32>, vector<128x128xf32>, vector<8x128xf32> -> vector<8x128xf32>
    %c0_24 = arith.constant 0 : index
    %c0_25 = arith.constant 0 : index
    %31 = vector.load %arg9[%c0_24, %c0_25] : memref<1x128xf32, #tpu.memory_space<vmem>>, vector<1x128xf32>
    %32 = vector.broadcast %31 : vector<1x128xf32> to vector<8x128xf32>
    %33 = arith.addf %30, %32 : vector<8x128xf32>
    %34 = arith.mulf %33, %33 : vector<8x128xf32>
    %cst_26 = arith.constant dense<0.000000e+00> : vector<8xf32>
    %35 = vector.multi_reduction <add>, %34, %cst_26 [1] : vector<8x128xf32> to vector<8xf32>
    %36 = vector.shape_cast %35 : vector<8xf32> to vector<8x1xf32>
    %cst_27 = arith.constant 1.000000e-24 : f32
    %37 = vector.broadcast %cst_27 : f32 to vector<8x1xf32>
    %38 = arith.maximumf %36, %37 : vector<8x1xf32>
    %39 = math.rsqrt %38 : vector<8x1xf32>
    %40 = vector.broadcast %39 : vector<8x1xf32> to vector<8x128xf32>
    %41 = arith.mulf %33, %40 : vector<8x128xf32>
    %42 = arith.truncf %20 : vector<8x128xf32> to vector<8x128xbf16>
    %43 = arith.truncf %41 : vector<8x128xf32> to vector<8x128xbf16>
    %cst_28 = arith.constant dense<0.000000e+00> : vector<8x8xf32>
    %44 = tpu.matmul %42, %43, %cst_28 {dimension_numbers = #tpu.dot_dimension_numbers<[1], [1], [0], [0], [0, 0, 1, 0], [], []>} : vector<8x128xbf16>, vector<8x128xbf16>, vector<8x8xf32> -> vector<8x8xf32>
    %cst_29 = arith.constant 14.2857141 : f32
    %45 = vector.broadcast %cst_29 : f32 to vector<8x8xf32>
    %46 = arith.mulf %44, %45 : vector<8x8xf32>
    %cst_30 = arith.constant dense<0.000000e+00> : vector<8x8xf32>
    %47 = tpu.matmul %42, %42, %cst_30 {dimension_numbers = #tpu.dot_dimension_numbers<[1], [1], [0], [0], [0, 0, 1, 0], [], []>} : vector<8x128xbf16>, vector<8x128xbf16>, vector<8x8xf32> -> vector<8x8xf32>
    %cst_31 = arith.constant 14.2857141 : f32
    %48 = vector.broadcast %cst_31 : f32 to vector<8x8xf32>
    %49 = arith.mulf %47, %48 : vector<8x8xf32>
    %cst_32 = arith.constant dense<0.000000e+00> : vector<8x8xf32>
    %50 = tpu.matmul %43, %43, %cst_32 {dimension_numbers = #tpu.dot_dimension_numbers<[1], [1], [0], [0], [0, 0, 1, 0], [], []>} : vector<8x128xbf16>, vector<8x128xbf16>, vector<8x8xf32> -> vector<8x8xf32>
    %cst_33 = arith.constant 14.2857141 : f32
    %51 = vector.broadcast %cst_33 : f32 to vector<8x8xf32>
    %52 = arith.mulf %50, %51 : vector<8x8xf32>
    %53 = tpu.iota {dimensions = array<i32: 0>} : vector<8x8xi32>
    %54 = tpu.iota {dimensions = array<i32: 1>} : vector<8x8xi32>
    %55 = arith.cmpi eq, %53, %54 : vector<8x8xi32>
    %cst_34 = arith.constant -1.000000e+09 : f32
    %56 = vector.broadcast %cst_34 : f32 to vector<8x8xf32>
    %57 = arith.select %55, %56, %49 : vector<8x8xi1>, vector<8x8xf32>
    %cst_35 = arith.constant -1.000000e+09 : f32
    %58 = vector.broadcast %cst_35 : f32 to vector<8x8xf32>
    %59 = arith.select %55, %58, %52 : vector<8x8xi1>, vector<8x8xf32>
    %cst_36 = arith.constant 0.000000e+00 : f32
    %60 = vector.broadcast %cst_36 : f32 to vector<8x8xf32>
    %61 = arith.select %55, %46, %60 : vector<8x8xi1>, vector<8x8xf32>
    %cst_37 = arith.constant dense<0.000000e+00> : vector<8xf32>
    %62 = vector.multi_reduction <add>, %61, %cst_37 [1] : vector<8x8xf32> to vector<8xf32>
    %63 = vector.shape_cast %62 : vector<8xf32> to vector<8x1xf32>
    %64 = vector.shape_cast %63 : vector<8x1xf32> to vector<1x8x1xf32>
    %cst_38 = arith.constant dense<0.000000e+00> : vector<1xf32>
    %65 = vector.multi_reduction <add>, %64, %cst_38 [1, 2] : vector<1x8x1xf32> to vector<1xf32>
    %66 = vector.shape_cast %65 : vector<1xf32> to vector<1x1x1xf32>
    %67 = vector.extract %66[0, 0, 0] : f32 from vector<1x1x1xf32>
    %68 = vector.shape_cast %63 : vector<8x1xf32> to vector<1x8xf32>
    %cst_39 = arith.constant dense<0xFF800000> : vector<8xf32>
    %69 = vector.multi_reduction <maximumf>, %46, %cst_39 [1] : vector<8x8xf32> to vector<8xf32>
    %70 = vector.shape_cast %69 : vector<8xf32> to vector<8x1xf32>
    %71 = vector.broadcast %70 : vector<8x1xf32> to vector<8x8xf32>
    %72 = arith.subf %46, %71 : vector<8x8xf32>
    %73 = math.exp %72 : vector<8x8xf32>
    %cst_40 = arith.constant dense<0.000000e+00> : vector<8xf32>
    %74 = vector.multi_reduction <add>, %73, %cst_40 [1] : vector<8x8xf32> to vector<8xf32>
    %75 = vector.shape_cast %74 : vector<8xf32> to vector<8x1xf32>
    %76 = math.log %75 : vector<8x1xf32>
    %77 = arith.addf %76, %70 : vector<8x1xf32>
    %cst_41 = arith.constant dense<0xFF800000> : vector<8xf32>
    %78 = vector.multi_reduction <maximumf>, %46, %cst_41 [0] : vector<8x8xf32> to vector<8xf32>
    %79 = vector.shape_cast %78 : vector<8xf32> to vector<1x8xf32>
    %80 = vector.broadcast %79 : vector<1x8xf32> to vector<8x8xf32>
    %81 = arith.subf %46, %80 : vector<8x8xf32>
    %82 = math.exp %81 : vector<8x8xf32>
    %cst_42 = arith.constant dense<0.000000e+00> : vector<8xf32>
    %83 = vector.multi_reduction <add>, %82, %cst_42 [0] : vector<8x8xf32> to vector<8xf32>
    %84 = vector.shape_cast %83 : vector<8xf32> to vector<1x8xf32>
    %85 = math.log %84 : vector<1x8xf32>
    %86 = arith.addf %85, %79 : vector<1x8xf32>
    %87 = vector.shape_cast %77 : vector<8x1xf32> to vector<1x8x1xf32>
    %cst_43 = arith.constant dense<0.000000e+00> : vector<1xf32>
    %88 = vector.multi_reduction <add>, %87, %cst_43 [1, 2] : vector<1x8x1xf32> to vector<1xf32>
    %89 = vector.shape_cast %88 : vector<1xf32> to vector<1x1x1xf32>
    %90 = vector.extract %89[0, 0, 0] : f32 from vector<1x1x1xf32>
    %91 = arith.subf %90, %67 : f32
    %cst_44 = arith.constant 8.000000e+00 : f32
    %92 = arith.divf %91, %cst_44 : f32
    %93 = vector.shape_cast %86 : vector<1x8xf32> to vector<1x1x8xf32>
    %cst_45 = arith.constant dense<0.000000e+00> : vector<1xf32>
    %94 = vector.multi_reduction <add>, %93, %cst_45 [1, 2] : vector<1x1x8xf32> to vector<1xf32>
    %95 = vector.shape_cast %94 : vector<1xf32> to vector<1x1x1xf32>
    %96 = vector.extract %95[0, 0, 0] : f32 from vector<1x1x1xf32>
    %97 = arith.subf %96, %67 : f32
    %cst_46 = arith.constant 8.000000e+00 : f32
    %98 = arith.divf %97, %cst_46 : f32
    %99 = arith.addf %92, %98 : f32
    %cst_47 = arith.constant 5.000000e-01 : f32
    %100 = arith.mulf %cst_47, %99 : f32
    %cst_48 = arith.constant dense<0xFF800000> : vector<8xf32>
    %101 = vector.multi_reduction <maximumf>, %57, %cst_48 [1] : vector<8x8xf32> to vector<8xf32>
    %102 = vector.shape_cast %101 : vector<8xf32> to vector<8x1xf32>
    %103 = arith.maximumf %70, %102 : vector<8x1xf32>
    %104 = arith.subf %70, %103 : vector<8x1xf32>
    %105 = math.exp %104 : vector<8x1xf32>
    %106 = arith.mulf %105, %75 : vector<8x1xf32>
    %107 = vector.broadcast %103 : vector<8x1xf32> to vector<8x8xf32>
    %108 = arith.subf %57, %107 : vector<8x8xf32>
    %109 = math.exp %108 : vector<8x8xf32>
    %cst_49 = arith.constant dense<0.000000e+00> : vector<8xf32>
    %110 = vector.multi_reduction <add>, %109, %cst_49 [1] : vector<8x8xf32> to vector<8xf32>
    %111 = vector.shape_cast %110 : vector<8xf32> to vector<8x1xf32>
    %112 = arith.addf %106, %111 : vector<8x1xf32>
    %113 = math.log %112 : vector<8x1xf32>
    %114 = arith.addf %113, %103 : vector<8x1xf32>
    %cst_50 = arith.constant dense<0xFF800000> : vector<8xf32>
    %115 = vector.multi_reduction <maximumf>, %59, %cst_50 [0] : vector<8x8xf32> to vector<8xf32>
    %116 = vector.shape_cast %115 : vector<8xf32> to vector<1x8xf32>
    %117 = arith.maximumf %79, %116 : vector<1x8xf32>
    %118 = arith.subf %79, %117 : vector<1x8xf32>
    %119 = math.exp %118 : vector<1x8xf32>
    %120 = arith.mulf %119, %84 : vector<1x8xf32>
    %121 = vector.broadcast %117 : vector<1x8xf32> to vector<8x8xf32>
    %122 = arith.subf %59, %121 : vector<8x8xf32>
    %123 = math.exp %122 : vector<8x8xf32>
    %cst_51 = arith.constant dense<0.000000e+00> : vector<8xf32>
    %124 = vector.multi_reduction <add>, %123, %cst_51 [0] : vector<8x8xf32> to vector<8xf32>
    %125 = vector.shape_cast %124 : vector<8xf32> to vector<1x8xf32>
    %126 = arith.addf %120, %125 : vector<1x8xf32>
    %127 = math.log %126 : vector<1x8xf32>
    %128 = arith.addf %127, %117 : vector<1x8xf32>
    %129 = vector.shape_cast %114 : vector<8x1xf32> to vector<1x8x1xf32>
    %cst_52 = arith.constant dense<0.000000e+00> : vector<1xf32>
    %130 = vector.multi_reduction <add>, %129, %cst_52 [1, 2] : vector<1x8x1xf32> to vector<1xf32>
    %131 = vector.shape_cast %130 : vector<1xf32> to vector<1x1x1xf32>
    %132 = vector.extract %131[0, 0, 0] : f32 from vector<1x1x1xf32>
    %133 = vector.shape_cast %128 : vector<1x8xf32> to vector<1x1x8xf32>
    %cst_53 = arith.constant dense<0.000000e+00> : vector<1xf32>
    %134 = vector.multi_reduction <add>, %133, %cst_53 [1, 2] : vector<1x1x8xf32> to vector<1xf32>
    %135 = vector.shape_cast %134 : vector<1xf32> to vector<1x1x1xf32>
    %136 = vector.extract %135[0, 0, 0] : f32 from vector<1x1x1xf32>
    %137 = arith.addf %132, %136 : f32
    %cst_54 = arith.constant 2.000000e+00 : f32
    %138 = arith.mulf %cst_54, %67 : f32
    %139 = arith.subf %137, %138 : f32
    %cst_55 = arith.constant 1.600000e+01 : f32
    %140 = arith.divf %139, %cst_55 : f32
    %c0_56 = arith.constant 0 : index
    %c0_57 = arith.constant 0 : index
    %141 = vector.load %arg10[%c0_56, %c0_57] : memref<8x1xi32, #tpu.memory_space<vmem>>, vector<8x1xi32>
    %c0_58 = arith.constant 0 : index
    %c0_59 = arith.constant 0 : index
    %142 = vector.load %arg11[%c0_58, %c0_59] : memref<1x8xi32, #tpu.memory_space<vmem>>, vector<1x8xi32>
    %143 = vector.broadcast %141 : vector<8x1xi32> to vector<8x8xi32>
    %144 = vector.broadcast %142 : vector<1x8xi32> to vector<8x8xi32>
    %145 = arith.cmpi eq, %143, %144 : vector<8x8xi32>
    %cst_60 = arith.constant dense<true> : vector<8x8xi1>
    %146 = arith.xori %55, %cst_60 : vector<8x8xi1>
    %147 = arith.andi %145, %146 : vector<8x8xi1>
    %148 = arith.extui %145 : vector<8x8xi1> to vector<8x8xi32>
    %149 = arith.sitofp %148 : vector<8x8xi32> to vector<8x8xf32>
    %cst_61 = arith.constant dense<0.000000e+00> : vector<8xf32>
    %150 = vector.multi_reduction <add>, %149, %cst_61 [1] : vector<8x8xf32> to vector<8xf32>
    %151 = vector.shape_cast %150 : vector<8xf32> to vector<8x1xf32>
    %152 = vector.shape_cast %151 : vector<8x1xf32> to vector<1x8xf32>
    %cst_62 = arith.constant 2.000000e+00 : f32
    %153 = vector.broadcast %cst_62 : f32 to vector<8x1xf32>
    %154 = arith.mulf %153, %151 : vector<8x1xf32>
    %cst_63 = arith.constant 1.000000e+00 : f32
    %155 = vector.broadcast %cst_63 : f32 to vector<8x1xf32>
    %156 = arith.subf %154, %155 : vector<8x1xf32>
    %cst_64 = arith.constant 1.000000e+00 : f32
    %157 = vector.broadcast %cst_64 : f32 to vector<8x1xf32>
    %158 = arith.maximumf %156, %157 : vector<8x1xf32>
    %cst_65 = arith.constant 2.000000e+00 : f32
    %159 = vector.broadcast %cst_65 : f32 to vector<1x8xf32>
    %160 = arith.mulf %159, %152 : vector<1x8xf32>
    %cst_66 = arith.constant 1.000000e+00 : f32
    %161 = vector.broadcast %cst_66 : f32 to vector<1x8xf32>
    %162 = arith.subf %160, %161 : vector<1x8xf32>
    %cst_67 = arith.constant 1.000000e+00 : f32
    %163 = vector.broadcast %cst_67 : f32 to vector<1x8xf32>
    %164 = arith.maximumf %162, %163 : vector<1x8xf32>
    %cst_68 = arith.constant 0.000000e+00 : f32
    %165 = vector.broadcast %cst_68 : f32 to vector<8x8xf32>
    %166 = arith.select %145, %46, %165 : vector<8x8xi1>, vector<8x8xf32>
    %cst_69 = arith.constant 0.000000e+00 : f32
    %167 = vector.broadcast %cst_69 : f32 to vector<8x8xf32>
    %168 = arith.select %147, %49, %167 : vector<8x8xi1>, vector<8x8xf32>
    %cst_70 = arith.constant dense<0.000000e+00> : vector<8xf32>
    %169 = vector.multi_reduction <add>, %168, %cst_70 [1] : vector<8x8xf32> to vector<8xf32>
    %170 = vector.shape_cast %169 : vector<8xf32> to vector<8x1xf32>
    %cst_71 = arith.constant dense<0.000000e+00> : vector<8xf32>
    %171 = vector.multi_reduction <add>, %166, %cst_71 [1] : vector<8x8xf32> to vector<8xf32>
    %172 = vector.shape_cast %171 : vector<8xf32> to vector<8x1xf32>
    %173 = arith.addf %170, %172 : vector<8x1xf32>
    %174 = arith.divf %173, %158 : vector<8x1xf32>
    %cst_72 = arith.constant dense<0.000000e+00> : vector<8xf32>
    %175 = vector.multi_reduction <add>, %166, %cst_72 [0] : vector<8x8xf32> to vector<8xf32>
    %176 = vector.shape_cast %175 : vector<8xf32> to vector<1x8xf32>
    %cst_73 = arith.constant 0.000000e+00 : f32
    %177 = vector.broadcast %cst_73 : f32 to vector<8x8xf32>
    %178 = arith.select %147, %52, %177 : vector<8x8xi1>, vector<8x8xf32>
    %cst_74 = arith.constant dense<0.000000e+00> : vector<8xf32>
    %179 = vector.multi_reduction <add>, %178, %cst_74 [0] : vector<8x8xf32> to vector<8xf32>
    %180 = vector.shape_cast %179 : vector<8xf32> to vector<1x8xf32>
    %181 = arith.addf %176, %180 : vector<1x8xf32>
    %182 = arith.divf %181, %164 : vector<1x8xf32>
    %183 = arith.subf %114, %174 : vector<8x1xf32>
    %184 = vector.shape_cast %183 : vector<8x1xf32> to vector<1x8x1xf32>
    %cst_75 = arith.constant dense<0.000000e+00> : vector<1xf32>
    %185 = vector.multi_reduction <add>, %184, %cst_75 [1, 2] : vector<1x8x1xf32> to vector<1xf32>
    %186 = vector.shape_cast %185 : vector<1xf32> to vector<1x1x1xf32>
    %187 = vector.extract %186[0, 0, 0] : f32 from vector<1x1x1xf32>
    %188 = arith.subf %128, %182 : vector<1x8xf32>
    %189 = vector.shape_cast %188 : vector<1x8xf32> to vector<1x1x8xf32>
    %cst_76 = arith.constant dense<0.000000e+00> : vector<1xf32>
    %190 = vector.multi_reduction <add>, %189, %cst_76 [1, 2] : vector<1x1x8xf32> to vector<1xf32>
    %191 = vector.shape_cast %190 : vector<1xf32> to vector<1x1x1xf32>
    %192 = vector.extract %191[0, 0, 0] : f32 from vector<1x1x1xf32>
    %193 = arith.addf %187, %192 : f32
    %cst_77 = arith.constant 1.600000e+01 : f32
    %194 = arith.divf %193, %cst_77 : f32
    %cst_78 = arith.constant 4.000000e-01 : f32
    %195 = arith.mulf %cst_78, %100 : f32
    %cst_79 = arith.constant 3.000000e-01 : f32
    %196 = arith.mulf %cst_79, %140 : f32
    %197 = arith.addf %195, %196 : f32
    %cst_80 = arith.constant 3.000000e-01 : f32
    %198 = arith.mulf %cst_80, %194 : f32
    %199 = arith.addf %197, %198 : f32
    %200 = vector.broadcast %63 : vector<8x1xf32> to vector<8x8xf32>
    %201 = arith.cmpf ogt, %46, %200 : vector<8x8xf32>
    %202 = arith.extui %201 : vector<8x8xi1> to vector<8x8xi32>
    %203 = arith.sitofp %202 : vector<8x8xi32> to vector<8x8xf32>
    %cst_81 = arith.constant dense<0.000000e+00> : vector<8xf32>
    %204 = vector.multi_reduction <add>, %203, %cst_81 [1] : vector<8x8xf32> to vector<8xf32>
    %205 = vector.shape_cast %204 : vector<8xf32> to vector<8x1xf32>
    %206 = vector.broadcast %68 : vector<1x8xf32> to vector<8x8xf32>
    %207 = arith.cmpf ogt, %46, %206 : vector<8x8xf32>
    %208 = arith.extui %207 : vector<8x8xi1> to vector<8x8xi32>
    %209 = arith.sitofp %208 : vector<8x8xi32> to vector<8x8xf32>
    %cst_82 = arith.constant dense<0.000000e+00> : vector<8xf32>
    %210 = vector.multi_reduction <add>, %209, %cst_82 [0] : vector<8x8xf32> to vector<8xf32>
    %211 = vector.shape_cast %210 : vector<8xf32> to vector<1x8xf32>
    %cst_83 = arith.constant 5.000000e-01 : f32
    %212 = vector.broadcast %cst_83 : f32 to vector<8x1xf32>
    %213 = arith.cmpf olt, %205, %212 : vector<8x1xf32>
    %214 = arith.extui %213 : vector<8x1xi1> to vector<8x1xi32>
    %215 = arith.sitofp %214 : vector<8x1xi32> to vector<8x1xf32>
    %216 = vector.shape_cast %215 : vector<8x1xf32> to vector<1x8x1xf32>
    %cst_84 = arith.constant dense<0.000000e+00> : vector<1xf32>
    %217 = vector.multi_reduction <add>, %216, %cst_84 [1, 2] : vector<1x8x1xf32> to vector<1xf32>
    %218 = vector.shape_cast %217 : vector<1xf32> to vector<1x1x1xf32>
    %219 = vector.extract %218[0, 0, 0] : f32 from vector<1x1x1xf32>
    %cst_85 = arith.constant 8.000000e+00 : f32
    %220 = arith.divf %219, %cst_85 : f32
    %cst_86 = arith.constant 5.000000e-01 : f32
    %221 = vector.broadcast %cst_86 : f32 to vector<1x8xf32>
    %222 = arith.cmpf olt, %211, %221 : vector<1x8xf32>
    %223 = arith.extui %222 : vector<1x8xi1> to vector<1x8xi32>
    %224 = arith.sitofp %223 : vector<1x8xi32> to vector<1x8xf32>
    %225 = vector.shape_cast %224 : vector<1x8xf32> to vector<1x1x8xf32>
    %cst_87 = arith.constant dense<0.000000e+00> : vector<1xf32>
    %226 = vector.multi_reduction <add>, %225, %cst_87 [1, 2] : vector<1x1x8xf32> to vector<1xf32>
    %227 = vector.shape_cast %226 : vector<1xf32> to vector<1x1x1xf32>
    %228 = vector.extract %227[0, 0, 0] : f32 from vector<1x1x1xf32>
    %cst_88 = arith.constant 8.000000e+00 : f32
    %229 = arith.divf %228, %cst_88 : f32
    %c0_89 = arith.constant 0 : index
    %230 = memref.load %arg12[%c0_89] : memref<16xf32, #tpu.memory_space<smem>>
    memref.store %199, %arg12[%c0_89] : memref<16xf32, #tpu.memory_space<smem>>
    %c1 = arith.constant 1 : index
    %231 = memref.load %arg12[%c1] : memref<16xf32, #tpu.memory_space<smem>>
    memref.store %100, %arg12[%c1] : memref<16xf32, #tpu.memory_space<smem>>
    %c2 = arith.constant 2 : index
    %232 = memref.load %arg12[%c2] : memref<16xf32, #tpu.memory_space<smem>>
    memref.store %140, %arg12[%c2] : memref<16xf32, #tpu.memory_space<smem>>
    %c3 = arith.constant 3 : index
    %233 = memref.load %arg12[%c3] : memref<16xf32, #tpu.memory_space<smem>>
    memref.store %194, %arg12[%c3] : memref<16xf32, #tpu.memory_space<smem>>
    %c4 = arith.constant 4 : index
    %234 = memref.load %arg12[%c4] : memref<16xf32, #tpu.memory_space<smem>>
    memref.store %220, %arg12[%c4] : memref<16xf32, #tpu.memory_space<smem>>
    %c5 = arith.constant 5 : index
    %235 = memref.load %arg12[%c5] : memref<16xf32, #tpu.memory_space<smem>>
    memref.store %229, %arg12[%c5] : memref<16xf32, #tpu.memory_space<smem>>
    %236 = arith.addf %220, %229 : f32
    %cst_90 = arith.constant 5.000000e-01 : f32
    %237 = arith.mulf %cst_90, %236 : f32
    %c6 = arith.constant 6 : index
    %238 = memref.load %arg12[%c6] : memref<16xf32, #tpu.memory_space<smem>>
    memref.store %237, %arg12[%c6] : memref<16xf32, #tpu.memory_space<smem>>
    %cst_91 = arith.constant 5.000000e-01 : f32
    %239 = vector.broadcast %cst_91 : f32 to vector<8x1xf32>
    %240 = arith.cmpf olt, %205, %239 : vector<8x1xf32>
    %241 = arith.extui %240 : vector<8x1xi1> to vector<8x1xi32>
    %242 = arith.sitofp %241 : vector<8x1xi32> to vector<8x1xf32>
    %243 = vector.shape_cast %242 : vector<8x1xf32> to vector<1x8x1xf32>
    %cst_92 = arith.constant dense<0.000000e+00> : vector<1xf32>
    %244 = vector.multi_reduction <add>, %243, %cst_92 [1, 2] : vector<1x8x1xf32> to vector<1xf32>
    %245 = vector.shape_cast %244 : vector<1xf32> to vector<1x1x1xf32>
    %246 = vector.extract %245[0, 0, 0] : f32 from vector<1x1x1xf32>
    %cst_93 = arith.constant 8.000000e+00 : f32
    %247 = arith.divf %246, %cst_93 : f32
    %cst_94 = arith.constant 5.000000e-01 : f32
    %248 = vector.broadcast %cst_94 : f32 to vector<1x8xf32>
    %249 = arith.cmpf olt, %211, %248 : vector<1x8xf32>
    %250 = arith.extui %249 : vector<1x8xi1> to vector<1x8xi32>
    %251 = arith.sitofp %250 : vector<1x8xi32> to vector<1x8xf32>
    %252 = vector.shape_cast %251 : vector<1x8xf32> to vector<1x1x8xf32>
    %cst_95 = arith.constant dense<0.000000e+00> : vector<1xf32>
    %253 = vector.multi_reduction <add>, %252, %cst_95 [1, 2] : vector<1x1x8xf32> to vector<1xf32>
    %254 = vector.shape_cast %253 : vector<1xf32> to vector<1x1x1xf32>
    %255 = vector.extract %254[0, 0, 0] : f32 from vector<1x1x1xf32>
    %cst_96 = arith.constant 8.000000e+00 : f32
    %256 = arith.divf %255, %cst_96 : f32
    %c7 = arith.constant 7 : index
    %257 = memref.load %arg12[%c7] : memref<16xf32, #tpu.memory_space<smem>>
    memref.store %247, %arg12[%c7] : memref<16xf32, #tpu.memory_space<smem>>
    %c8 = arith.constant 8 : index
    %258 = memref.load %arg12[%c8] : memref<16xf32, #tpu.memory_space<smem>>
    memref.store %256, %arg12[%c8] : memref<16xf32, #tpu.memory_space<smem>>
    %259 = arith.addf %247, %256 : f32
    %cst_97 = arith.constant 5.000000e-01 : f32
    %260 = arith.mulf %cst_97, %259 : f32
    %c9 = arith.constant 9 : index
    %261 = memref.load %arg12[%c9] : memref<16xf32, #tpu.memory_space<smem>>
    memref.store %260, %arg12[%c9] : memref<16xf32, #tpu.memory_space<smem>>
    %cst_98 = arith.constant 4.500000e+00 : f32
    %262 = vector.broadcast %cst_98 : f32 to vector<8x1xf32>
    %263 = arith.cmpf olt, %205, %262 : vector<8x1xf32>
    %264 = arith.extui %263 : vector<8x1xi1> to vector<8x1xi32>
    %265 = arith.sitofp %264 : vector<8x1xi32> to vector<8x1xf32>
    %266 = vector.shape_cast %265 : vector<8x1xf32> to vector<1x8x1xf32>
    %cst_99 = arith.constant dense<0.000000e+00> : vector<1xf32>
    %267 = vector.multi_reduction <add>, %266, %cst_99 [1, 2] : vector<1x8x1xf32> to vector<1xf32>
    %268 = vector.shape_cast %267 : vector<1xf32> to vector<1x1x1xf32>
    %269 = vector.extract %268[0, 0, 0] : f32 from vector<1x1x1xf32>
    %cst_100 = arith.constant 8.000000e+00 : f32
    %270 = arith.divf %269, %cst_100 : f32
    %cst_101 = arith.constant 4.500000e+00 : f32
    %271 = vector.broadcast %cst_101 : f32 to vector<1x8xf32>
    %272 = arith.cmpf olt, %211, %271 : vector<1x8xf32>
    %273 = arith.extui %272 : vector<1x8xi1> to vector<1x8xi32>
    %274 = arith.sitofp %273 : vector<1x8xi32> to vector<1x8xf32>
    %275 = vector.shape_cast %274 : vector<1x8xf32> to vector<1x1x8xf32>
    %cst_102 = arith.constant dense<0.000000e+00> : vector<1xf32>
    %276 = vector.multi_reduction <add>, %275, %cst_102 [1, 2] : vector<1x1x8xf32> to vector<1xf32>
    %277 = vector.shape_cast %276 : vector<1xf32> to vector<1x1x1xf32>
    %278 = vector.extract %277[0, 0, 0] : f32 from vector<1x1x1xf32>
    %cst_103 = arith.constant 8.000000e+00 : f32
    %279 = arith.divf %278, %cst_103 : f32
    %c10 = arith.constant 10 : index
    %280 = memref.load %arg12[%c10] : memref<16xf32, #tpu.memory_space<smem>>
    memref.store %270, %arg12[%c10] : memref<16xf32, #tpu.memory_space<smem>>
    %c11 = arith.constant 11 : index
    %281 = memref.load %arg12[%c11] : memref<16xf32, #tpu.memory_space<smem>>
    memref.store %279, %arg12[%c11] : memref<16xf32, #tpu.memory_space<smem>>
    %282 = arith.addf %270, %279 : f32
    %cst_104 = arith.constant 5.000000e-01 : f32
    %283 = arith.mulf %cst_104, %282 : f32
    %c12 = arith.constant 12 : index
    %284 = memref.load %arg12[%c12] : memref<16xf32, #tpu.memory_space<smem>>
    memref.store %283, %arg12[%c12] : memref<16xf32, #tpu.memory_space<smem>>
    %cst_105 = arith.constant 7.500000e+00 : f32
    %285 = vector.broadcast %cst_105 : f32 to vector<8x1xf32>
    %286 = arith.cmpf olt, %205, %285 : vector<8x1xf32>
    %287 = arith.extui %286 : vector<8x1xi1> to vector<8x1xi32>
    %288 = arith.sitofp %287 : vector<8x1xi32> to vector<8x1xf32>
    %289 = vector.shape_cast %288 : vector<8x1xf32> to vector<1x8x1xf32>
    %cst_106 = arith.constant dense<0.000000e+00> : vector<1xf32>
    %290 = vector.multi_reduction <add>, %289, %cst_106 [1, 2] : vector<1x8x1xf32> to vector<1xf32>
    %291 = vector.shape_cast %290 : vector<1xf32> to vector<1x1x1xf32>
    %292 = vector.extract %291[0, 0, 0] : f32 from vector<1x1x1xf32>
    %cst_107 = arith.constant 8.000000e+00 : f32
    %293 = arith.divf %292, %cst_107 : f32
    %cst_108 = arith.constant 7.500000e+00 : f32
    %294 = vector.broadcast %cst_108 : f32 to vector<1x8xf32>
    %295 = arith.cmpf olt, %211, %294 : vector<1x8xf32>
    %296 = arith.extui %295 : vector<1x8xi1> to vector<1x8xi32>
    %297 = arith.sitofp %296 : vector<1x8xi32> to vector<1x8xf32>
    %298 = vector.shape_cast %297 : vector<1x8xf32> to vector<1x1x8xf32>
    %cst_109 = arith.constant dense<0.000000e+00> : vector<1xf32>
    %299 = vector.multi_reduction <add>, %298, %cst_109 [1, 2] : vector<1x1x8xf32> to vector<1xf32>
    %300 = vector.shape_cast %299 : vector<1xf32> to vector<1x1x1xf32>
    %301 = vector.extract %300[0, 0, 0] : f32 from vector<1x1x1xf32>
    %cst_110 = arith.constant 8.000000e+00 : f32
    %302 = arith.divf %301, %cst_110 : f32
    %c13 = arith.constant 13 : index
    %303 = memref.load %arg12[%c13] : memref<16xf32, #tpu.memory_space<smem>>
    memref.store %293, %arg12[%c13] : memref<16xf32, #tpu.memory_space<smem>>
    %c14 = arith.constant 14 : index
    %304 = memref.load %arg12[%c14] : memref<16xf32, #tpu.memory_space<smem>>
    memref.store %302, %arg12[%c14] : memref<16xf32, #tpu.memory_space<smem>>
    %305 = arith.addf %293, %302 : f32
    %cst_111 = arith.constant 5.000000e-01 : f32
    %306 = arith.mulf %cst_111, %305 : f32
    %c15 = arith.constant 15 : index
    %307 = memref.load %arg12[%c15] : memref<16xf32, #tpu.memory_space<smem>>
    memref.store %306, %arg12[%c15] : memref<16xf32, #tpu.memory_space<smem>>
    return
  }
}

</mosaic_0001>

<bundles_post_ra>
// kernel: tpu_custom_call.1
= control target key start
LH: loop header
LB: loop body
LE: loop exit
PB: predicated region body
PF: predicated region fallthrough
CT: control target
= control target key end

     0   :  { %17 = vsyncpa [#allocation3], 0  ;;  %s1361_s0 = inlined_call_operand.vmem [shape: f32[8,128], index: 0, kind: input, shape index: {}]   ;;  %s1362_s1 = inlined_call_operand.hbm [shape: f32[8,128], index: 1, kind: input, shape index: {}]   ;;  %s1363_s2 = inlined_call_operand.hbm [shape: f32[128,128], index: 2, kind: input, shape index: {}]   ;;  %s1364_s3 = inlined_call_operand.vmem [shape: f32[1,128], index: 3, kind: input, shape index: {}]   ;;  %s1365_s4 = inlined_call_operand.hbm [shape: f32[128,128], index: 4, kind: input, shape index: {}]   ;;  %s1366_s5 = inlined_call_operand.vmem [shape: f32[1,128], index: 5, kind: input, shape index: {}]   ;;  %s1367_s6 = inlined_call_operand.hbm [shape: f32[128,128], index: 6, kind: input, shape index: {}]   ;;  %s1368_s7 = inlined_call_operand.vmem [shape: f32[1,128], index: 7, kind: input, shape index: {}]   ;;  %s1369_s8 = inlined_call_operand.hbm [shape: f32[128,128], index: 8, kind: input, shape index: {}]   ;;  %s1370_s9 = inlined_call_operand.vmem [shape: f32[1,128], index: 9, kind: input, shape index: {}]   ;;  %s1371_s10 = inlined_call_operand.vmem [shape: s32[8,1], index: 10, kind: input, shape index: {}]   ;;  %s1372_s11 = inlined_call_operand.vmem [shape: s32[1,8], index: 11, kind: input, shape index: {}]   ;;  %s1373_s12 = inlined_call_operand.hbm [shape: f32[16], index: 12, kind: output, shape index: {}]  }
   0x1   :  { %18 = vsyncpa [#allocation6], 0 }
   0x2   :  { %19 = vsyncpa [#allocation9], 0  ;;  %s38_s23 = sshll.u32 %s1363_s2, 4  ;;  %s39_s23 = int_to_ptr.hbm [resolvable:$true] %s38_s23 }
   0x3   :  { %20 = vsyncpa [#allocation4], 0  ;;  %s1092_s24 = smov [#allocation5]   ;;  %s68_s28 = sshll.u32 %s1367_s6, 4  ;;  %s69_s28 = int_to_ptr.hbm [resolvable:$true] %s68_s28 }
   0x4   :  { %s40_s25 = sshll.u32 %s1092_s24, 4  ;;  %s1093_s29 = smov 128   ;;  %s41_s25 = int_to_ptr.vmem [resolvable:$true] %s40_s25 }
   0x5   :  { %s1094_s30 = smov 8   ;;  %s1095_s13 = smov [#allocation8]  }
   0x6   :  { %46 = dma.hbm_to_vmem [thread:$0]  %s39_s23, 2048, %s41_s25, [#allocation6], %s1093_s29, %s1093_s29, %s1094_s30  }
   0x7   :  { %s70_s14 = sshll.u32 %s1095_s13, 4  ;;  %s28_s17 = sshll.u32 %s1362_s1, 4  ;;  %s71_s14 = int_to_ptr.vmem [resolvable:$true] %s70_s14  ;;  %s29_s17 = int_to_ptr.hbm [resolvable:$true] %s28_s17 }
   0x8   :  { %76 = dma.hbm_to_vmem [thread:$0]  %s69_s28, 2048, %s71_s14, [#allocation9], %s1093_s29, %s1093_s29, %s1094_s30  }
   0x9   :  { %s53_s19 = sshll.u32 %s1365_s4, 4  ;;  %s1096_s20 = smov [#allocation2]   ;;  %s54_s19 = int_to_ptr.hbm [resolvable:$true] %s53_s19 }
   0xa   :  { %s30_s21 = sshll.u32 %s1096_s20, 4  ;;  %s1097_s6 = smov [#allocation7]   ;;  %s31_s21 = int_to_ptr.vmem [resolvable:$true] %s30_s21 }
   0xb   :  { %33 = dma.hbm_to_vmem [thread:$0]  %s29_s17, 128, %s31_s21, [#allocation3]  }
   0xc   :  { %s55_s22 = sshll.u32 %s1097_s6, 4  ;;  %s83_s25 = sshll.u32 %s1369_s8, 4  ;;  %s56_s22 = int_to_ptr.vmem [resolvable:$true] %s55_s22  ;;  %s84_s25 = int_to_ptr.hbm [resolvable:$true] %s83_s25 }
   0xd   :  { %61 = dma.hbm_to_vmem [thread:$0]  %s54_s19, 2048, %s56_s22, [#allocation6], %s1093_s29, %s1093_s29, %s1094_s30  }
   0xe   :  { %s1098_s1 = smov [#allocation10]  }
   0xf   :  { %s85_s26 = sshll.u32 %s1098_s1, 4  ;;  %s86_s26 = int_to_ptr.vmem [resolvable:$true] %s85_s26 }
  0x10   :  { %91 = dma.hbm_to_vmem [thread:$0]  %s84_s25, 2048, %s86_s26, [#allocation9], %s1093_s29, %s1093_s29, %s1094_s30  }
  0x11   :  { %1084 = dma.done.wait [#allocation3], 128  }
  0x12   :  { %1085 = vsyncadd [#allocation3], 4294967168 }
  0x13   :  { %1086 = dma.done.wait [#allocation6], 4096  }
  0x14   :  { %1087 = vsyncadd [#allocation6], 4294963200 }
  0x15   :  { %1088 = dma.done.wait [#allocation9], 4096  }
  0x16   :  { %1089 = vsyncadd [#allocation9], 4294963200  ;;  %v135_v0 = vld [vmem:[#allocation5 + $0x78] sm:$0xff]  ;;  %v134_v2 = vld [vmem:[#allocation5 + $0x70] sm:$0xff]  ;;  %vm365_vm0 = vcmask 64512   ;;  %vm1101_vm9 = vmmov 1  }
  0x17   :  { %v232_v1 = vld [vmem:[#allocation8 + $0x78] sm:$0xff]  ;;  %140 = vmatpush.msra.mxu0 %v135_v0  ;;  %v231_v3 = vld [vmem:[#allocation8 + $0x70] sm:$0xff]  ;;  %v133_v4 = vld [vmem:[#allocation5 + $0x68] sm:$0xff] }
  0x18   :  { %237 = vmatpush.msra.mxu2 %v232_v1  ;;  %v230_v5 = vld [vmem:[#allocation8 + $0x68] sm:$0xff]  ;;  %v132_v6 = vld [vmem:[#allocation5 + $0x60] sm:$0xff]  ;;  %v131_v8 = vld [vmem:[#allocation5 + $0x58] sm:$0xff] }
  0x19   :  { %141 = vmatpush.msra.mxu0 %v134_v2  ;;  %v229_v7 = vld [vmem:[#allocation8 + $0x60] sm:$0xff]  ;;  %v228_v9 = vld [vmem:[#allocation8 + $0x58] sm:$0xff]  ;;  %v130_v10 = vld [vmem:[#allocation5 + $0x50] sm:$0xff] }
  0x1a   :  { %238 = vmatpush.msra.mxu2 %v231_v3  ;;  %v227_v11 = vld [vmem:[#allocation8 + $0x50] sm:$0xff]  ;;  %v129_v12 = vld [vmem:[#allocation5 + $0x48] sm:$0xff]  ;;  %v176_v14 = vld [vmem:[#allocation7 + $0x78] sm:$0xff] }
  0x1b   :  { %142 = vmatpush.msra.mxu0 %v133_v4  ;;  %v226_v13 = vld [vmem:[#allocation8 + $0x48] sm:$0xff]  ;;  %v175_v15 = vld [vmem:[#allocation7 + $0x70] sm:$0xff]  ;;  %v128_v16 = vld [vmem:[#allocation5 + $0x40] sm:$0xff]  ;;  %181 = vmatpush.msra.mxu1 %v176_v14 }
  0x1c   :  { %239 = vmatpush.msra.mxu2 %v230_v5  ;;  %v225_v17 = vld [vmem:[#allocation8 + $0x40] sm:$0xff]  ;;  %v273_v18 = vld [vmem:[#allocation10 + $0x78] sm:$0xff]  ;;  %v174_v19 = vld [vmem:[#allocation7 + $0x68] sm:$0xff] }
  0x1d   :  { %143 = vmatpush.msra.mxu0 %v132_v6  ;;  %v272_v20 = vld [vmem:[#allocation10 + $0x70] sm:$0xff]  ;;  %v127_v21 = vld [vmem:[#allocation5 + $0x38] sm:$0xff]  ;;  %182 = vmatpush.msra.mxu1 %v175_v15  ;;  %v173_v23 = vld [vmem:[#allocation7 + $0x60] sm:$0xff] }
  0x1e   :  { %240 = vmatpush.msra.mxu2 %v229_v7  ;;  %v224_v22 = vld [vmem:[#allocation8 + $0x38] sm:$0xff]  ;;  %278 = vmatpush.msra.mxu3 %v273_v18  ;;  %v271_v24 = vld [vmem:[#allocation10 + $0x68] sm:$0xff]  ;;  %v126_v25 = vld [vmem:[#allocation5 + $0x30] sm:$0xff] }
  0x1f   :  { %144 = vmatpush.msra.mxu0 %v131_v8  ;;  %v223_v26 = vld [vmem:[#allocation8 + $0x30] sm:$0xff]  ;;  %v125_v27 = vld [vmem:[#allocation5 + $0x28] sm:$0xff]  ;;  %183 = vmatpush.msra.mxu1 %v174_v19  ;;  %v172_v29 = vld [vmem:[#allocation7 + $0x58] sm:$0xff] }
  0x20   :  { %241 = vmatpush.msra.mxu2 %v228_v9  ;;  %279 = vmatpush.msra.mxu3 %v272_v20  ;;  %v222_v28 = vld [vmem:[#allocation8 + $0x28] sm:$0xff]  ;;  %v270_v30 = vld [vmem:[#allocation10 + $0x60] sm:$0xff]  ;;  %v171_v33 = vld [vmem:[#allocation7 + $0x50] sm:$0xff] }
  0x21   :  { %145 = vmatpush.msra.mxu0 %v130_v10  ;;  %v124_v31 = vld [vmem:[#allocation5 + $0x20] sm:$0xff]  ;;  %184 = vmatpush.msra.mxu1 %v173_v23  ;;  %v269_v34 = vld [vmem:[#allocation10 + $0x58] sm:$0xff]  ;;  %v170_v35 = vld [vmem:[#allocation7 + $0x48] sm:$0xff] }
  0x22   :  { %242 = vmatpush.msra.mxu2 %v227_v11  ;;  %v221_v32 = vld [vmem:[#allocation8 + $0x20] sm:$0xff]  ;;  %280 = vmatpush.msra.mxu3 %v271_v24  ;;  %v268_v36 = vld [vmem:[#allocation10 + $0x50] sm:$0xff]  ;;  %v123_v37 = vld [vmem:[#allocation5 + $0x18] sm:$0xff]  ;;  %v1099_v11 = vmov 0  }
  0x23   :  { %146 = vmatpush.msra.mxu0 %v129_v12  ;;  %185 = vmatpush.msra.mxu1 %v172_v29  ;;  %v220_v38 = vld [vmem:[#allocation8 + $0x18] sm:$0xff]  ;;  %v169_v39 = vld [vmem:[#allocation7 + $0x40] sm:$0xff]  ;;  %v267_v40 = vld [vmem:[#allocation10 + $0x48] sm:$0xff] }
  0x24   :  { %243 = vmatpush.msra.mxu2 %v226_v13  ;;  %281 = vmatpush.msra.mxu3 %v270_v30  ;;  %v122_v41 = vld [vmem:[#allocation5 + $0x10] sm:$0xff]  ;;  %v168_v43 = vld [vmem:[#allocation7 + $0x38] sm:$0xff]  ;;  %v266_v44 = vld [vmem:[#allocation10 + $0x40] sm:$0xff]  ;;  %v1100_v30 = vmov 0.0  }
  0x25   :  { %147 = vmatpush.msra.mxu0 %v128_v16  ;;  %186 = vmatpush.msra.mxu1 %v171_v33  ;;  %v219_v42 = vld [vmem:[#allocation8 + $0x10] sm:$0xff]  ;;  %v121_v45 = vld [vmem:[#allocation5 + $0x8] sm:$0xff]  ;;  %v265_v48 = vld [vmem:[#allocation10 + $0x38] sm:$0xff] }
  0x26   :  { %244 = vmatpush.msra.mxu2 %v225_v17  ;;  %282 = vmatpush.msra.mxu3 %v269_v34  ;;  %v218_v46 = vld [vmem:[#allocation8 + $0x8] sm:$0xff]  ;;  %v167_v47 = vld [vmem:[#allocation7 + $0x30] sm:$0xff]  ;;  %v120_v49 = vld [vmem:[#allocation5] sm:$0xff] }
  0x27   :  { %148 = vmatpush.msra.mxu0 %v127_v21  ;;  %187 = vmatpush.msra.mxu1 %v170_v35  ;;  %v217_v50 = vld [vmem:[#allocation8] sm:$0xff]  ;;  %v119_v51 = vld [vmem:[%s1361_s0] sm:$0xff]  ;;  %v166_v53 = vld [vmem:[#allocation7 + $0x28] sm:$0xff] }
  0x28   :  { %245 = vmatpush.msra.mxu2 %v224_v22  ;;  %283 = vmatpush.msra.mxu3 %v268_v36  ;;  %v216_v52 = vld [vmem:[#allocation2] sm:$0xff]  ;;  %v264_v54 = vld [vmem:[#allocation10 + $0x30] sm:$0xff]  ;;  %v165_v55 = vld [vmem:[#allocation7 + $0x20] sm:$0xff] }
  0x29   :  { %149 = vmatpush.msra.mxu0 %v126_v25  ;;  %188 = vmatpush.msra.mxu1 %v169_v39  ;;  %v164_v56 = vld [vmem:[#allocation7 + $0x18] sm:$0xff]  ;;  %v163_v57 = vld [vmem:[#allocation7 + $0x10] sm:$0xff]  ;;  %v263_v58 = vld [vmem:[#allocation10 + $0x28] sm:$0xff] }
  0x2a   :  { %246 = vmatpush.msra.mxu2 %v223_v26  ;;  %284 = vmatpush.msra.mxu3 %v267_v40  ;;  %v162_v59 = vld [vmem:[#allocation7 + $0x8] sm:$0xff]  ;;  %v262_v60 = vld [vmem:[#allocation10 + $0x20] sm:$0xff]  ;;  %v261_v62 = vld [vmem:[#allocation10 + $0x18] sm:$0xff] }
  0x2b   :  { %150 = vmatpush.msra.mxu0 %v125_v27  ;;  %189 = vmatpush.msra.mxu1 %v168_v43  ;;  %v161_v61 = vld [vmem:[#allocation7] sm:$0xff]  ;;  %v260_v63 = vld [vmem:[#allocation10 + $0x10] sm:$0xff]  ;;  %v259_v0 = vld [vmem:[#allocation10 + $0x8] sm:$0xff] }
  0x2c   :  { %247 = vmatpush.msra.mxu2 %v222_v28  ;;  %285 = vmatpush.msra.mxu3 %v266_v44  ;;  %v258_v1 = vld [vmem:[#allocation10] sm:$0xff]  ;;  %v915_v2 = vld [vmem:[%s1364_s3] ss:$0 sm:$0xff] }
  0x2d   :  { %151 = vmatpush.msra.mxu0 %v124_v31  ;;  %190 = vmatpush.msra.mxu1 %v167_v47  ;;  %v916_v6 = vld [vmem:[%s1368_s7] ss:$0 sm:$0xff] }
  0x2e   :  { %248 = vmatpush.msra.mxu2 %v221_v32  ;;  %286 = vmatpush.msra.mxu3 %v265_v48  ;;  %v530_v10 = vld [vmem:[%s1371_s10] sm:$0xff]  ;;  %v357_v48 = vlaneseq }
  0x2f   :  { %152 = vmatpush.msra.mxu0 %v123_v37  ;;  %191 = vmatpush.msra.mxu1 %v166_v53  ;;  %v917_v12 = vld [vmem:[%s1366_s5] ss:$0 sm:$0xff] }
  0x30   :  { %249 = vmatpush.msra.mxu2 %v220_v38  ;;  %287 = vmatpush.msra.mxu3 %v264_v54  ;;  %v918_v16 = vld [vmem:[%s1370_s9] ss:$0 sm:$0xff] }
  0x31   :  { %153 = vmatpush.msra.mxu0 %v122_v41  ;;  %192 = vmatpush.msra.mxu1 %v165_v55  ;;  %v1206_v26 = vld [vmem:[%s1372_s11] ss:$0 sm:$0xff] }
  0x32   :  { %250 = vmatpush.msra.mxu2 %v219_v42  ;;  %288 = vmatpush.msra.mxu3 %v263_v58 }
  0x33   :  { %154 = vmatpush.msra.mxu0 %v121_v45  ;;  %193 = vmatpush.msra.mxu1 %v164_v56 }
  0x34   :  { %251 = vmatpush.msra.mxu2 %v218_v46  ;;  %289 = vmatpush.msra.mxu3 %v262_v60 }
  0x35   :  { %155 = vmatpush.msra.mxu0 %v120_v49  ;;  %194 = vmatpush.msra.mxu1 %v163_v57 }
  0x36   :  { %252 = vmatpush.msra.mxu2 %v217_v50  ;;  %156 = vmatmul.f32.vlgmr.msra.gmra.mxu0 %v119_v51  ;;  %v358_v50 = vshrl.u32 %v357_v48, 7  ;;  %v1217_v51 = vand.u32 127, %v357_v48 }
  0x37   :  { %253 = vmatmul.f32.vlgmr.msra.gmra.mxu2 %v216_v52  ;;  %195 = vmatpush.msra.mxu1 %v162_v59 }
  0x38   :  { %290 = vmatpush.msra.mxu3 %v261_v62  ;;  %913 = vset.pattern.permute.xlu2 %v1099_v11  ;;  %vm361_vm8 = vcmp.eq.s32.totalorder %v358_v50, %v1217_v51 }
  0x39   :  { %196 = vmatpush.msra.mxu1 %v161_v61  ;;  %914 = vset.pattern.permute.xlu0 %v1099_v11  ;;  %vm537_vm10 = vmxor %vm361_vm8, %vm1101_vm9 }
  0x3a   :  { %291 = vmatpush.msra.mxu3 %v260_v63  ;;  %533 = vperm.xlu2 %913, %v530_v10  }
  0x3c   :  { %292 = vmatpush.msra.mxu3 %v259_v0 }
  0x3e   :  { %293 = vmatpush.msra.mxu3 %v258_v1 }
  0x94   :  { %v1208_v27 = vpop.permute.xlu2 %533 }
  0x95   :  { %vm536_vm1 = vcmp.eq.s32.totalorder %v1208_v27, %v1206_v26 }
  0x96   :  { %v860_v31 = vsel %vm536_vm1, 1.0, %v1100_v30  ;;  %vm1257_vm11 = vmand %vm536_vm1, %vm537_vm10 }
  0x97   :  { %v541_v33 = vsel %vm365_vm0, %v860_v31, 0.0 }
  0xb3   :  { %v157_v3 = vpop.f32.mrf.mxu0 }
  0xb4   :  { %v158_v4 = vadd.f32 %v915_v2, %v157_v3 }
  0xb6   :  { %v160_v5 = vmax.f32 %v158_v4, 0.0 }
  0xb8   :  { %197 = vmatmul.f32.vlgmr.msra.gmra.mxu1 %v160_v5 }
  0xba   :  { %v254_v7 = vpop.f32.mrf.mxu2 }
  0xbb   :  { %v255_v8 = vadd.f32 %v916_v6, %v254_v7 }
  0xbd   :  { %v257_v9 = vmax.f32 %v255_v8, 0.0 }
  0xbf   :  { %294 = vmatmul.f32.vlgmr.msra.gmra.mxu3 %v257_v9 }
 0x135   :  { %v198_v13 = vpop.f32.mrf.mxu1 }
 0x136   :  { %v199_v14 = vadd.f32 %v917_v12, %v198_v13 }
 0x138   :  { %v201_v15 = vmul.f32 %v199_v14, %v199_v14 }
 0x13a   :  { %202 = vadd.xlane.f32.xlu0 %v201_v15 }
 0x142   :  { %v295_v17 = vpop.f32.mrf.mxu3 }
 0x143   :  { %v296_v18 = vadd.f32 %v918_v16, %v295_v17 }
 0x145   :  { %v298_v19 = vmul.f32 %v296_v18, %v296_v18 }
 0x147   :  { %299 = vadd.xlane.f32.xlu0 %v298_v19 }
 0x14f   :  { %542 = vadd.xlane.f32.xlu0 %v541_v33 }
 0x1ad   :  { %v203_v20 = vpop.xlane.xlu0 %202 }
 0x1ae   :  { %v204_v21 = vmax.f32 %v203_v20, 1e-24 }
 0x1b0   :  { %920 = vrsqrt.f32 %v204_v21  ;;  %vm211_vm3 = vweird.f32 %v204_v21 }
 0x1b6   :  { %v921_v22 = vpop.eup %920 }
 0x1b7   :  { %v206_v23 = vmul.f32 %v921_v22, %v204_v21  ;;  %vm212_vm2 = vweird.f32 %v921_v22 }
 0x1b8   :  { %vm213_vm4 = vmor %vm211_vm3, %vm212_vm2 }
 0x1b9   :  { %v207_v24 = vmul.f32 %v921_v22, %v206_v23 }
 0x1ba   :  { %v300_v25 = vpop.xlane.xlu0 %299 }
 0x1bb   :  { %v301_v28 = vmax.f32 %v300_v25, 1e-24  ;;  %v208_v29 = vmul.f32 0.5, %v207_v24 }
 0x1bd   :  { %922 = vrsqrt.f32 %v301_v28  ;;  %v209_v32 = vsub.f32 1.5, %v208_v29  ;;  %vm308_vm6 = vweird.f32 %v301_v28 }
 0x1bf   :  { %v210_v34 = vmul.f32 %v921_v22, %v209_v32 }
 0x1c1   :  { %v214_v35 = vsel %vm213_vm4, %v921_v22, %v210_v34  ;;  %vm369_vm4 = vcmask 7168  }
 0x1c2   :  { %v215_v37 = vmul.f32 %v214_v35, %v199_v14  ;;  %v543_v2 = vpop.xlane.xlu0 %542 }
 0x1c3   :  { %v923_v36 = vpop.eup %922  ;;  %v544_v8 = vmul.f32 2.0, %v543_v2 }
 0x1c4   :  { %v303_v38 = vmul.f32 %v923_v36, %v301_v28  ;;  %v313_v39 = vpack.c.bf16 %v215_v37, %v215_v37  ;;  %vm309_vm5 = vweird.f32 %v923_v36 }
 0x1c5   :  { %vm310_vm7 = vmor %vm308_vm6, %vm309_vm5  ;;  %v861_v14 = vadd.f32 -1.0, %v544_v8 }
 0x1c6   :  { %v304_v40 = vmul.f32 %v923_v36, %v303_v38  ;;  %336 = vmatpush.bf16.xpose.msrb.mxu1 %v313_v39 }
 0x1c8   :  { %v305_v41 = vmul.f32 0.5, %v304_v40 }
 0x1ca   :  { %v306_v42 = vsub.f32 1.5, %v305_v41 }
 0x1cc   :  { %v307_v43 = vmul.f32 %v923_v36, %v306_v42 }
 0x1cd   :  { %337 = vmatmul.bf16.vlgmr.msrb.gmra.mxu1 %v313_v39 }
 0x1ce   :  { %v311_v44 = vsel %vm310_vm7, %v923_v36, %v307_v43 }
 0x1cf   :  { %v312_v45 = vmul.f32 %v311_v44, %v296_v18  ;;  %v1244_v18 = vmax.f32 %v861_v14, 1.0 }
 0x1d1   :  { %v314_v46 = vpack.c.bf16 %v312_v45, %v312_v45  ;;  %v587_v21 = vperm.slane %v1244_v18, %v1217_v51  ;;  %vm561_vm5 = vweird.f32 %v1244_v18 }
 0x1d3   :  { %322 = vmatpush.bf16.xpose.msrb.mxu0 %v314_v46  ;;  %350 = vmatpush.bf16.xpose.msrb.mxu2 %v314_v46  ;;  %vm594_vm12 = vweird.f32 %v587_v21 }
 0x1da   :  { %323 = vmatmul.bf16.vlgmr.msrb.gmra.mxu0 %v313_v39  ;;  %351 = vmatmul.bf16.vlgmr.msrb.gmra.mxu2 %v314_v46 }
 0x24a   :  { %v338_v47 = vpop.f32.mrf.mxu1 }
 0x24b   :  { %v1227_v56 = vmul.f32 14.285714, %v338_v47 }
 0x24d   :  { %v1233_v0 = vsel %vm361_vm8, -1e+09, %v1227_v56 }
 0x24e   :  { %v454_v6 = vsel %vm365_vm0, %v1233_v0, -inf }
 0x252   :  { %v340_v49 = vpop.f32.mrf.mxu1 }
 0x257   :  { %v324_v52 = vpop.f32.mrf.mxu0 }
 0x258   :  { %v1219_v53 = vmul.f32 14.285714, %v324_v52 }
 0x25a   :  { %v380_v54 = vsel %vm365_vm0, %v1219_v53, -inf  ;;  %v364_v55 = vsel %vm361_vm8, %v1219_v53, 0.0  ;;  %v547_v32 = vsel %vm536_vm1, %v1219_v53, 0.0  ;;  %vm431_vm1 = vcmask 57344  }
 0x25b   :  { %381 = vmax.xlane.f32.xlu1 %v380_v54  ;;  %v392_v57 = vrot.slane %v380_v54, 4  ;;  %v366_v58 = vsel %vm365_vm0, %v364_v55, 0.0  ;;  %v1270_v36 = vsel %vm365_vm0, %v547_v32, 0.0 }
 0x25c   :  { %367 = vadd.xlane.f32.xlu2 %v366_v58  ;;  %v571_v41 = vrot.slane %v1270_v36, 4 }
 0x25d   :  { %v393_v59 = vmax.f32 %v380_v54, %v392_v57  ;;  %v352_v60 = vpop.f32.mrf.mxu2 }
 0x25e   :  { %v356_v61 = vmul.f32 14.285714, %v352_v60  ;;  %v572_v47 = vadd.f32 %v571_v41, %v1270_v36 }
 0x25f   :  { %v394_v62 = vrot.slane %v393_v59, 2  ;;  %v326_v63 = vpop.f32.mrf.mxu0 }
 0x260   :  { %v363_v1 = vsel %vm361_vm8, -1e+09, %v356_v61  ;;  %v577_v28 = vsel %vm1257_vm11, %v356_v61, 0.0  ;;  %v573_v54 = vrot.slane %v572_v47, 2 }
 0x261   :  { %v395_v3 = vmax.f32 %v393_v59, %v394_v62  ;;  %v472_v4 = vsel %vm365_vm0, %v363_v1, -inf  ;;  %v578_v33 = vsel %vm365_vm0, %v577_v28, 0.0 }
 0x262   :  { %v473_v5 = vrot.slane %v472_v4, 4  ;;  %v579_v38 = vrot.slane %v578_v33, 4  ;;  %v574_v62 = vadd.f32 %v573_v54, %v572_v47 }
 0x263   :  { %v396_v7 = vrot.slane %v395_v3, 1  ;;  %455 = vmax.xlane.f32.xlu1 %v454_v6 }
 0x264   :  { %v474_v9 = vmax.f32 %v472_v4, %v473_v5  ;;  %v580_v44 = vadd.f32 %v579_v38, %v578_v33  ;;  %v575_v8 = vrot.slane %v574_v62, 1 }
 0x265   :  { %v1240_v10 = vmax.f32 %v395_v3, %v396_v7  ;;  %v354_v11 = vpop.f32.mrf.mxu2  ;;  %v600_v7 = vand.u32 2147483648, %v587_v21 }
 0x266   :  { %v475_v12 = vrot.slane %v474_v9, 2  ;;  %v581_v50 = vrot.slane %v580_v44, 2  ;;  %v598_v11 = vand.u32 2147483647, %v587_v21  ;;  %v576_v14 = vadd.f32 %v575_v8, %v574_v62 }
 0x267   :  { %v398_v13 = vsub.f32 %v1219_v53, %v1240_v10 }
 0x268   :  { %v476_v15 = vmax.f32 %v474_v9, %v475_v12  ;;  %v582_v58 = vadd.f32 %v581_v50, %v580_v44  ;;  %vm599_vm15 = vcmp.eq.f32.partialorder %v598_v11, 8.507059e+37 }
 0x269   :  { %v399_v16 = vmul.f32 1.442695, %v398_v13  ;;  %v601_v13 = vor.u32 1.1754944e-38, %v600_v7 }
 0x26a   :  { %v477_v17 = vrot.slane %v476_v15, 1  ;;  %v583_v4 = vrot.slane %v582_v58, 1 }
 0x26b   :  { %924 = vpow2.f32 %v399_v16 }
 0x26c   :  { %v478_v19 = vmax.f32 %v476_v15, %v477_v17  ;;  %926 = vrcp.f32 %v587_v21  ;;  %v584_v12 = vadd.f32 %v583_v4, %v582_v58 }
 0x26e   :  { %v1249_v20 = vmax.f32 %v1240_v10, %v478_v19  ;;  %v585_v16 = vadd.f32 %v584_v12, %v576_v14 }
 0x270   :  { %v484_v22 = vsub.f32 %v363_v1, %v1249_v20  ;;  %v480_v37 = vsub.f32 %v1240_v10, %v1249_v20 }
 0x271   :  { %v925_v23 = vpop.eup %924 }
 0x272   :  { %v485_v25 = vmul.f32 1.442695, %v484_v22  ;;  %v401_v29 = vsel %vm365_vm0, %v925_v23, 0.0  ;;  %v927_v40 = vpop.eup %926  ;;  %v481_v26 = vmul.f32 1.442695, %v480_v37 }
 0x273   :  { %v402_v31 = vrot.slane %v401_v29, 4  ;;  %v590_v48 = vmul.f32 %v927_v40, %v587_v21  ;;  %vm595_vm13 = vweird.f32 %v927_v40 }
 0x274   :  { %928 = vpow2.f32 %v485_v25  ;;  %vm596_vm14 = vmor %vm594_vm12, %vm595_vm13 }
 0x275   :  { %v403_v34 = vadd.f32 %v402_v31, %v401_v29  ;;  %v591_v55 = vsub.f32 1.0, %v590_v48 }
 0x277   :  { %v404_v35 = vrot.slane %v403_v34, 2  ;;  %v592_v63 = vmul.f32 %v927_v40, %v591_v55 }
 0x279   :  { %v405_v39 = vadd.f32 %v404_v35, %v403_v34  ;;  %v593_v9 = vadd.f32 %v927_v40, %v592_v63 }
 0x27a   :  { %v929_v42 = vpop.eup %928 }
 0x27b   :  { %v406_v43 = vrot.slane %v405_v39, 1  ;;  %v487_v27 = vsel %vm365_vm0, %v929_v42, 0.0  ;;  %v597_v15 = vsel %vm596_vm14, %v927_v40, %v593_v9  ;;  %v548_v40 = vsel %vm1257_vm11, %v1227_v56, 0.0 }
 0x27c   :  { %v488_v45 = vrot.slane %v487_v27, 4  ;;  %v602_v19 = vsel %vm599_vm15, %v601_v13, %v597_v15  ;;  %v549_v42 = vsel %vm365_vm0, %v548_v40, 0.0 }
 0x27d   :  { %v407_v46 = vadd.f32 %v406_v43, %v405_v39  ;;  %v603_v25 = vmul.f32 %v602_v19, %v585_v16 }
 0x27e   :  { %v489_v49 = vadd.f32 %v488_v45, %v487_v27 }
 0x27f   :  { %930 = vlog2.f32 %v407_v46 }
 0x280   :  { %932 = vpow2.f32 %v481_v26  ;;  %v490_v52 = vrot.slane %v489_v49, 2 }
 0x282   :  { %v491_v57 = vadd.f32 %v490_v52, %v489_v49 }
 0x284   :  { %v492_v60 = vrot.slane %v491_v57, 1 }
 0x285   :  { %v931_v59 = vpop.eup %930 }
 0x286   :  { %v933_v61 = vpop.eup %932  ;;  %v409_v1 = vmul.f32 0.6931472, %v931_v59  ;;  %v493_v3 = vadd.f32 %v492_v60, %v491_v57 }
 0x287   :  { %v483_v2 = vmul.f32 %v933_v61, %v407_v46 }
 0x288   :  { %v410_v5 = vadd.f32 %v409_v1, %v1240_v10 }
 0x289   :  { %v494_v6 = vadd.f32 %v493_v3, %v483_v2  ;;  %v567_v3 = vand.u32 2147483648, %v1244_v18 }
 0x28a   :  { %v432_v49 = vsel %vm431_vm1, %v410_v5, 0.0  ;;  %v565_v5 = vand.u32 2147483647, %v1244_v18 }
 0x28b   :  { %934 = vlog2.f32 %v494_v6  ;;  %v568_v9 = vor.u32 1.1754944e-38, %v567_v3 }
 0x28c   :  { %vm566_vm10 = vcmp.eq.f32.partialorder %v565_v5, 8.507059e+37 }
 0x291   :  { %v935_v17 = vpop.eup %934 }
 0x292   :  { %v496_v22 = vmul.f32 0.6931472, %v935_v17 }
 0x294   :  { %v497_v23 = vadd.f32 %v496_v22, %v1249_v20 }
 0x296   :  { %v508_v10 = vsel %vm431_vm1, %v497_v23, 0.0  ;;  %v615_v28 = vsub.f32 %v497_v23, %v603_v25 }
 0x297   :  { %509 = vadd.xlane.f32.xlu2 %v508_v10 }
 0x298   :  { %v616_v45 = vsel %vm431_vm1, %v615_v28, 0.0 }
 0x2ce   :  { %v1280_v21 = vpop.xlane.xlu1 %381 }
 0x2cf   :  { %v383_v29 = vsub.f32 %v1219_v53, %v1280_v21  ;;  %v368_v33 = vpop.xlane.xlu2 %367 }
 0x2d0   :  { %v648_v37 = vperm.slane %v368_v33, %v1217_v51  ;;  %vm641_vm3 = vcmp.gt.f32.partialorder %v1219_v53, %v368_v33 }
 0x2d1   :  { %v384_v31 = vmul.f32 1.442695, %v383_v29  ;;  %v862_v27 = vsel %vm641_vm3, 1.0, %v1100_v30 }
 0x2d2   :  { %vm662_vm2 = vcmp.gt.f32.partialorder %v1219_v53, %v648_v37  ;;  %v644_v44 = vsel %vm365_vm0, %v862_v27, 0.0  ;;  %v370_v53 = vsel %vm369_vm4, %v368_v33, 0.0 }
 0x2d3   :  { %936 = vpow2.f32 %v384_v31  ;;  %v863_v41 = vsel %vm662_vm2, 1.0, %v1100_v30 }
 0x2d6   :  { %v456_v32 = vpop.xlane.xlu1 %455 }
 0x2d7   :  { %v1285_v34 = vmax.f32 %v1280_v21, %v456_v32 }
 0x2d9   :  { %v937_v35 = vpop.eup %936  ;;  %v462_v20 = vsub.f32 %v1233_v0, %v1285_v34  ;;  %v665_v0 = vsel %vm365_vm0, %v863_v41, 0.0  ;;  %v458_v52 = vsub.f32 %v1280_v21, %v1285_v34 }
 0x2da   :  { %v386_v38 = vsel %vm365_vm0, %v937_v35, 0.0  ;;  %v666_v26 = vrot.slane %v665_v0, 4 }
 0x2db   :  { %v463_v39 = vmul.f32 1.442695, %v462_v20  ;;  %387 = vadd.xlane.f32.xlu1 %v386_v38  ;;  %v459_v55 = vmul.f32 1.442695, %v458_v52 }
 0x2dc   :  { %v667_v24 = vadd.f32 %v666_v26, %v665_v0 }
 0x2dd   :  { %938 = vpow2.f32 %v463_v39 }
 0x2de   :  { %v668_v56 = vrot.slane %v667_v24, 2  ;;  %940 = vrcp.f32 %v1244_v18 }
 0x2df   :  { %942 = vpow2.f32 %v459_v55 }
 0x2e0   :  { %v669_v46 = vadd.f32 %v668_v56, %v667_v24  ;;  %v1102_v24 = vmov 8.0  }
 0x2e2   :  { %v670_v47 = vrot.slane %v669_v46, 1 }
 0x2e3   :  { %550 = vadd.xlane.f32.xlu1 %v549_v42  ;;  %v939_v43 = vpop.eup %938 }
 0x2e4   :  { %v465_v51 = vsel %vm365_vm0, %v939_v43, 0.0  ;;  %v1305_v48 = vadd.f32 %v670_v47, %v669_v46  ;;  %v941_v54 = vpop.eup %940 }
 0x2e5   :  { %466 = vadd.xlane.f32.xlu0 %v465_v51  ;;  %v557_v58 = vmul.f32 %v941_v54, %v1244_v18  ;;  %v943_v61 = vpop.eup %942  ;;  %vm562_vm6 = vweird.f32 %v941_v54 }
 0x2e6   :  { %vm694_vm0 = vcmp.lt.f32.partialorder %v1305_v48, 0.5  ;;  %vm1318_vm7 = vmor %vm561_vm5, %vm562_vm6  ;;  %vm760_vm11 = vcmp.lt.f32.partialorder %v1305_v48, 4.5  ;;  %vm812_vm13 = vcmp.lt.f32.partialorder %v1305_v48, 7.5 }
 0x2e7   :  { %v865_v50 = vsel %vm694_vm0, 1.0, %v1100_v30  ;;  %v558_v59 = vsub.f32 1.0, %v557_v58  ;;  %v867_v28 = vsel %vm760_vm11, 1.0, %v1100_v30  ;;  %v869_v0 = vsel %vm812_vm13, 1.0, %v1100_v30 }
 0x2e8   :  { %v763_v35 = vsel %vm431_vm1, %v867_v28, 0.0  ;;  %v815_v51 = vsel %vm431_vm1, %v869_v0, 0.0 }
 0x2e9   :  { %v559_v63 = vmul.f32 %v941_v54, %v558_v59 }
 0x2eb   :  { %645 = vadd.xlane.f32.xlu1 %v644_v44  ;;  %v560_v4 = vadd.f32 %v941_v54, %v559_v63 }
 0x2ed   :  { %553 = vadd.xlane.f32.xlu0 %v1270_v36  ;;  %v697_v36 = vsel %vm431_vm1, %v865_v50, 0.0  ;;  %v564_v11 = vsel %vm1318_vm7, %v941_v54, %v560_v4  ;;  %v1103_v50 = vmov 16.0  }
 0x2ee   :  { %v569_v23 = vsel %vm566_vm10, %v568_v9, %v564_v11 }
 0x2f3   :  { %617 = vadd.xlane.f32.xlu1 %v616_v45 }
 0x2f5   :  { %371 = vadd.xlane.f32.xlu0 %v370_v53 }
 0x2fd   :  { %433 = vadd.xlane.f32.xlu0 %v432_v49 }
 0x305   :  { %698 = vadd.xlane.f32.xlu0 %v697_v36 }
 0x30a   :  { %v510_v44 = vpop.xlane.xlu2 %509 }
 0x30b   :  { %v511_v36 = vrot.slane %v510_v44, 4 }
 0x34e   :  { %v388_v57 = vpop.xlane.xlu1 %387 }
 0x34f   :  { %v461_v62 = vmul.f32 %v943_v61, %v388_v57  ;;  %944 = vlog2.f32 %v388_v57  ;;  %v512_v61 = vadd.f32 %v511_v36, %v510_v44 }
 0x351   :  { %v513_v11 = vrot.slane %v512_v61, 2 }
 0x355   :  { %v945_v8 = vpop.eup %944 }
 0x356   :  { %v551_v60 = vpop.xlane.xlu1 %550  ;;  %v390_v17 = vmul.f32 0.6931472, %v945_v8 }
 0x358   :  { %v467_v1 = vpop.xlane.xlu0 %466  ;;  %v391_v29 = vadd.f32 %v390_v17, %v1280_v21 }
 0x359   :  { %v468_v2 = vadd.f32 %v467_v1, %v461_v62 }
 0x35a   :  { %v411_v37 = vsel %vm369_vm4, %v391_v29, 0.0 }
 0x35b   :  { %946 = vlog2.f32 %v468_v2 }
 0x35c   :  { %948 = vrcp.f32 %v1102_v24 }
 0x35d   :  { %950 = vrcp.f32 %v1103_v50 }
 0x35e   :  { %v646_v7 = vpop.xlane.xlu1 %645 }
 0x35f   :  { %vm672_vm8 = vcmp.lt.f32.partialorder %v646_v7, 0.5  ;;  %vm738_vm9 = vcmp.lt.f32.partialorder %v646_v7, 4.5  ;;  %vm790_vm12 = vcmp.lt.f32.partialorder %v646_v7, 7.5 }
 0x360   :  { %v864_v12 = vsel %vm672_vm8, 1.0, %v1100_v30  ;;  %v866_v13 = vsel %vm738_vm9, 1.0, %v1100_v30  ;;  %v554_v14 = vpop.xlane.xlu0 %553 }
 0x361   :  { %v675_v18 = vsel %vm369_vm4, %v864_v12, 0.0  ;;  %v741_v15 = vsel %vm369_vm4, %v866_v13, 0.0  ;;  %v947_v16 = vpop.eup %946  ;;  %v555_v19 = vadd.f32 %v554_v14, %v551_v60 }
 0x362   :  { %676 = vadd.xlane.f32.xlu2 %v675_v18  ;;  %742 = vadd.xlane.f32.xlu1 %v741_v15  ;;  %v470_v22 = vmul.f32 0.6931472, %v947_v16  ;;  %v949_v46 = vpop.eup %948 }
 0x363   :  { %v570_v25 = vmul.f32 %v569_v23, %v555_v19  ;;  %v423_v49 = vmul.f32 8.0, %v949_v46  ;;  %v1341_v55 = vpop.eup %950  ;;  %vm427_vm14 = vweird.f32 %v949_v46 }
 0x364   :  { %v471_v10 = vadd.f32 %v470_v22, %v1285_v34  ;;  %v868_v34 = vsel %vm790_vm12, 1.0, %v1100_v30  ;;  %v522_v3 = vmul.f32 16.0, %v1341_v55  ;;  %vm526_vm15 = vweird.f32 %v1341_v55 }
 0x365   :  { %v793_v21 = vsel %vm369_vm4, %v868_v34, 0.0  ;;  %v424_v30 = vsub.f32 1.0, %v423_v49 }
 0x366   :  { %v604_v31 = vsub.f32 %v471_v10, %v570_v25  ;;  %v498_v41 = vsel %vm369_vm4, %v471_v10, 0.0  ;;  %v618_v27 = vpop.xlane.xlu1 %617  ;;  %v523_v19 = vsub.f32 1.0, %v522_v3 }
 0x367   :  { %v619_v59 = vrot.slane %v618_v27, 4  ;;  %v425_v63 = vmul.f32 %v949_v46, %v424_v30 }
 0x368   :  { %v372_v32 = vpop.xlane.xlu0 %371  ;;  %v605_v33 = vsel %vm369_vm4, %v604_v31, 0.0  ;;  %v524_v34 = vmul.f32 %v1341_v55, %v523_v19 }
 0x369   :  { %v373_v20 = vrot.slane %v372_v32, 4  ;;  %606 = vadd.xlane.f32.xlu0 %v605_v33  ;;  %v620_v7 = vadd.f32 %v619_v59, %v618_v27  ;;  %v426_v18 = vadd.f32 %v949_v46, %v425_v63 }
 0x36a   :  { %764 = vadd.xlane.f32.xlu2 %v763_v35  ;;  %412 = vadd.xlane.f32.xlu1 %v411_v37 }
 0x36b   :  { %v374_v38 = vadd.f32 %v373_v20, %v372_v32  ;;  %v621_v28 = vrot.slane %v620_v7, 2  ;;  %v428_v37 = vsel %vm427_vm14, %v949_v46, %v426_v18 }
 0x36d   :  { %v375_v39 = vrot.slane %v374_v38, 2  ;;  %v622_v27 = vadd.f32 %v621_v28, %v620_v7 }
 0x36f   :  { %v376_v40 = vadd.f32 %v375_v39, %v374_v38  ;;  %v514_v39 = vadd.f32 %v513_v11, %v512_v61 }
 0x370   :  { %v434_v26 = vpop.xlane.xlu0 %433 }
 0x371   :  { %794 = vadd.xlane.f32.xlu0 %v793_v21  ;;  %v377_v42 = vrot.slane %v376_v40, 1  ;;  %v435_v53 = vrot.slane %v434_v26, 4  ;;  %v515_v24 = vrot.slane %v514_v39, 1 }
 0x372   :  { %499 = vadd.xlane.f32.xlu1 %v498_v41 }
 0x373   :  { %v378_v43 = vadd.f32 %v377_v42, %v376_v40  ;;  %v436_v48 = vadd.f32 %v435_v53, %v434_v26 }
 0x375   :  { %870 = vpush %v378_v43  ;;  %v437_v57 = vrot.slane %v436_v48, 2 }
 0x377   :  { %v438_v6 = vadd.f32 %v437_v57, %v436_v48  ;;  %v516_v57 = vadd.f32 %v515_v24, %v514_v39 }
 0x378   :  { %v699_v56 = vpop.xlane.xlu0 %698 }
 0x379   :  { %v700_v4 = vrot.slane %v699_v56, 4  ;;  %v439_v10 = vrot.slane %v438_v6, 1 }
 0x37a   :  { %816 = vadd.xlane.f32.xlu1 %v815_v51 }
 0x37b   :  { %v701_v22 = vadd.f32 %v700_v4, %v699_v56  ;;  %v440_v41 = vadd.f32 %v439_v10, %v438_v6  ;;  %v525_v56 = vadd.f32 %v1341_v55, %v524_v34 }
 0x37d   :  { %v702_v40 = vrot.slane %v701_v22, 2 }
 0x3a6   :  { %s871_s9 = spop %870 }
 0x3a7   :  { %s519_s6 = smul.f32 2.0, %s871_s9 }
 0x3d5   :  { %v743_v45 = vpop.xlane.xlu1 %742  ;;  %v677_v47 = vpop.xlane.xlu2 %676 }
 0x3d6   :  { %v678_v1 = vrot.slane %v677_v47, 4  ;;  %v744_v8 = vrot.slane %v743_v45, 4 }
 0x3d8   :  { %v679_v15 = vadd.f32 %v678_v1, %v677_v47  ;;  %v745_v29 = vadd.f32 %v744_v8, %v743_v45  ;;  %v703_v47 = vadd.f32 %v702_v40, %v701_v22 }
 0x3da   :  { %v680_v38 = vrot.slane %v679_v15, 2  ;;  %v746_v42 = vrot.slane %v745_v29, 2  ;;  %v704_v61 = vrot.slane %v703_v47, 1 }
 0x3dc   :  { %v607_v52 = vpop.xlane.xlu0 %606  ;;  %v681_v45 = vadd.f32 %v680_v38, %v679_v15  ;;  %v747_v48 = vadd.f32 %v746_v42, %v745_v29  ;;  %v705_v6 = vadd.f32 %v704_v61, %v703_v47 }
 0x3dd   :  { %v413_v54 = vpop.xlane.xlu1 %412  ;;  %v608_v60 = vrot.slane %v607_v52, 4  ;;  %v765_v2 = vpop.xlane.xlu2 %764 }
 0x3de   :  { %v414_v58 = vrot.slane %v413_v54, 4  ;;  %v766_v12 = vrot.slane %v765_v2, 4  ;;  %v682_v59 = vrot.slane %v681_v45, 1  ;;  %v748_v63 = vrot.slane %v747_v48, 1 }
 0x3df   :  { %v609_v9 = vadd.f32 %v608_v60, %v607_v52 }
 0x3e0   :  { %v415_v62 = vadd.f32 %v414_v58, %v413_v54  ;;  %v767_v33 = vadd.f32 %v766_v12, %v765_v2  ;;  %v623_v54 = vrot.slane %v622_v27, 1  ;;  %v527_v58 = vsel %vm526_vm15, %v1341_v55, %v525_v56 }
 0x3e1   :  { %v610_v31 = vrot.slane %v609_v9, 2  ;;  %v749_v8 = vadd.f32 %v748_v63, %v747_v48 }
 0x3e2   :  { %v416_v5 = vrot.slane %v415_v62, 2  ;;  %v768_v51 = vrot.slane %v767_v33, 2  ;;  %v624_v3 = vadd.f32 %v623_v54, %v622_v27 }
 0x3e3   :  { %v611_v0 = vadd.f32 %v610_v31, %v609_v9 }
 0x3e4   :  { %v795_v13 = vpop.xlane.xlu0 %794  ;;  %v417_v14 = vadd.f32 %v416_v5, %v415_v62  ;;  %v769_v36 = vadd.f32 %v768_v51, %v767_v33  ;;  %v683_v5 = vadd.f32 %v682_v59, %v681_v45 }
 0x3e5   :  { %v796_v16 = vrot.slane %v795_v13, 4  ;;  %v500_v17 = vpop.xlane.xlu1 %499  ;;  %v612_v50 = vrot.slane %v611_v0, 1 }
 0x3e6   :  { %v501_v23 = vrot.slane %v500_v17, 4  ;;  %v418_v25 = vrot.slane %v417_v14, 1  ;;  %v770_v4 = vrot.slane %v769_v36, 1 }
 0x3e7   :  { %v797_v32 = vadd.f32 %v796_v16, %v795_v13  ;;  %v613_v62 = vadd.f32 %v612_v50, %v611_v0 }
 0x3e8   :  { %v502_v35 = vadd.f32 %v501_v23, %v500_v17  ;;  %v419_v20 = vadd.f32 %v418_v25, %v417_v14  ;;  %v771_v9 = vadd.f32 %v770_v4, %v769_v36 }
 0x3e9   :  { %v798_v43 = vrot.slane %v797_v32, 2 }
 0x3ea   :  { %v503_v21 = vrot.slane %v502_v35, 2  ;;  %872 = vpush %v419_v20 }
 0x3eb   :  { %874 = vpush %v428_v37  ;;  %v799_v49 = vadd.f32 %v798_v43, %v797_v32 }
 0x3ec   :  { %876 = vpush %v440_v41  ;;  %v504_v26 = vadd.f32 %v503_v21, %v502_v35 }
 0x3ed   :  { %v817_v44 = vpop.xlane.xlu1 %816  ;;  %v800_v1 = vrot.slane %v799_v49, 1 }
 0x3ee   :  { %v818_v46 = vrot.slane %v817_v44, 4  ;;  %v505_v53 = vrot.slane %v504_v26, 1 }
 0x3ef   :  { %v801_v55 = vadd.f32 %v800_v1, %v799_v49 }
 0x3f0   :  { %v819_v52 = vadd.f32 %v818_v46, %v817_v44  ;;  %v506_v30 = vadd.f32 %v505_v53, %v504_v26 }
 0x3f2   :  { %v820_v60 = vrot.slane %v819_v52, 2  ;;  %878 = vpush %v506_v30 }
 0x3f3   :  { %880 = vpush %v516_v57 }
 0x3f4   :  { %v821_v2 = vadd.f32 %v820_v60, %v819_v52  ;;  %882 = vpush %v527_v58 }
 0x3f5   :  { %884 = vpush %v613_v62 }
 0x3f6   :  { %886 = vpush %v624_v3  ;;  %v822_v7 = vrot.slane %v821_v2, 1 }
 0x3f7   :  { %888 = vpush %v683_v5 }
 0x3f8   :  { %890 = vpush %v705_v6  ;;  %v823_v11 = vadd.f32 %v822_v7, %v821_v2 }
 0x3f9   :  { %892 = vpush %v749_v8 }
 0x3fa   :  { %894 = vpush %v771_v9 }
 0x3fb   :  { %896 = vpush %v801_v55 }
 0x3fc   :  { %898 = vpush %v823_v11 }
 0x41b   :  { %s873_s11 = spop %872 }
 0x41c   :  { %s421_s16 = ssub.f32 %s873_s11, %s871_s9  ;;  %s1348_s17 = spop %874 }
 0x41d   :  { %s877_s2 = spop %876 }
 0x41e   :  { %s430_s18 = smul.f32 %s1348_s17, %s421_s16  ;;  %s442_s19 = ssub.f32 %s877_s2, %s871_s9 }
 0x420   :  { %s451_s20 = smul.f32 %s1348_s17, %s442_s19 }
 0x422   :  { %s452_s21 = sadd.f32 %s451_s20, %s430_s18 }
 0x423   :  { %s879_s22 = spop %878 }
 0x424   :  { %s453_s23 = smul.f32 0.5, %s452_s21  ;;  %s881_s24 = spop %880 }
 0x425   :  { %s518_s25 = sadd.f32 %s881_s24, %s879_s22  ;;  %s883_s1 = spop %882 }
 0x426   :  { %719 = sst [smem:[#allocation11 + $0x1]] %s453_s23  ;;  %s885_s4 = spop %884 }
 0x427   :  { %s520_s26 = ssub.f32 %s518_s25, %s519_s6  ;;  %s887_s8 = spop %886 }
 0x428   :  { %s626_s27 = sadd.f32 %s887_s8, %s885_s4  ;;  %s636_s28 = smul.f32 0.4, %s453_s23 }
 0x429   :  { %s529_s0 = smul.f32 %s883_s1, %s520_s26  ;;  %s889_s29 = spop %888 }
 0x42a   :  { %s635_s13 = smul.f32 %s883_s1, %s626_s27  ;;  %s891_s3 = spop %890 }
 0x42b   :  { %s637_s30 = smul.f32 0.3, %s529_s0  ;;  %721 = sst [smem:[#allocation11 + $0x2]] %s529_s0 }
 0x42c   :  { %s693_s7 = smul.f32 %s889_s29, %s1348_s17  ;;  %723 = sst [smem:[#allocation11 + $0x3]] %s635_s13 }
 0x42d   :  { %s638_s14 = sadd.f32 %s637_s30, %s636_s28  ;;  %s639_s15 = smul.f32 0.3, %s635_s13 }
 0x42e   :  { %725 = sst [smem:[#allocation11 + $0x4]] %s693_s7  ;;  %s715_s5 = smul.f32 %s891_s3, %s1348_s17 }
 0x42f   :  { %s640_s10 = sadd.f32 %s639_s15, %s638_s14  ;;  %s893_s9 = spop %892 }
 0x430   :  { %733 = sst [smem:[#allocation11 + $0x7]] %s693_s7  ;;  %s759_s11 = smul.f32 %s893_s9, %s1348_s17 }
 0x431   :  { %717 = sst [smem:[#allocation11]] %s640_s10  ;;  %s895_s16 = spop %894 }
 0x432   :  { %727 = sst [smem:[#allocation11 + $0x5]] %s715_s5  ;;  %s781_s2 = smul.f32 %s895_s16, %s1348_s17 }
 0x433   :  { %s728_s18 = sadd.f32 %s715_s5, %s693_s7  ;;  %s897_s19 = spop %896 }
 0x434   :  { %735 = sst [smem:[#allocation11 + $0x8]] %s715_s5  ;;  %s811_s20 = smul.f32 %s897_s19, %s1348_s17 }
 0x435   :  { %s729_s21 = smul.f32 0.5, %s728_s18  ;;  %783 = sst [smem:[#allocation11 + $0xa]] %s759_s11 }
 0x436   :  { %785 = sst [smem:[#allocation11 + $0xb]] %s781_s2  ;;  %s899_s6 = spop %898 }
 0x437   :  { %731 = sst [smem:[#allocation11 + $0x6]] %s729_s21  ;;  %s833_s22 = smul.f32 %s899_s6, %s1348_s17 }
 0x438   :  { %737 = sst [smem:[#allocation11 + $0x9]] %s729_s21  ;;  %s847_s1 = sshll.u32 %s1373_s12, 4  ;;  %s848_s1 = int_to_ptr.hbm [resolvable:$true] %s847_s1 }
 0x439   :  { %s786_s23 = sadd.f32 %s781_s2, %s759_s11  ;;  %s1104_s0 = smov [#allocation11]  }
 0x43a   :  { %835 = sst [smem:[#allocation11 + $0xd]] %s811_s20 }
 0x43b   :  { %s787_s26 = smul.f32 0.5, %s786_s23  ;;  %837 = sst [smem:[#allocation11 + $0xe]] %s833_s22 }
 0x43c   :  { %s838_s4 = sadd.f32 %s833_s22, %s811_s20 }
 0x43d   :  { %789 = sst [smem:[#allocation11 + $0xc]] %s787_s26 }
 0x43e   :  { %s839_s8 = smul.f32 0.5, %s838_s4 }
 0x440   :  { %841 = sst [smem:[#allocation11 + $0xf]] %s839_s8 }
 0x441   :  { %850 = dma.smem_to_hbm %s1104_s0, 16, %s848_s1, [#allocation4]  }
 0x442   :  { %1090 = dma.done.wait [#allocation4], 16  }
 0x443   :  { %1091 = vsyncadd [#allocation4], 4294967280 }
 0x444   :  { %855 = sfence }
 0x445   :  { %856 = vsyncpa [#allocation3], 1 }
 0x446   :  { %857 = vsyncpa [#allocation6], 1 }
 0x447   :  { %858 = vsyncpa [#allocation9], 1 }
 0x448   :  { %859 = vsyncpa [#allocation4], 1 }

</bundles_post_ra>
